<compile_context>
chip_gen: v6e
topology: v6e:2x2x1
jax: 0.10.0
libtpu: 0.0.40
codegen_flags: <defaults>
</compile_context>

<pallas_src>
import functools
import math

import jax
import jax.numpy as jnp
from jax import lax
from jax.experimental import pallas as pl
from jax.experimental.pallas import tpu as pltpu


# ----------------------------- VMEM-aware tiling config ------------------------------

KIN_TILE = 512            # contraction tile for the plain (non-LN) linear path
MAX_G_TILE = 64           # hard cap on attention slabs per grid step


@functools.lru_cache(maxsize=None)
def _vmem_capacity_bytes():
    try:
        return int(pltpu.get_tpu_info().vmem_capacity_bytes)
    except Exception:
        return 64 * 1024 * 1024          # conservative fallback (v7x-sized)


@functools.lru_cache(maxsize=None)
def _vmem_limit_bytes():
    # ~96 MiB on 128 MiB parts (v5e/v6e), ~48 MiB on v7x's 64 MiB VMEM.
    return min(_vmem_capacity_bytes() * 3 // 4, 100 * 1024 * 1024)


@functools.lru_cache(maxsize=None)
def _row_tile():
    return 1024 if _vmem_capacity_bytes() >= 100 * 1024 * 1024 else 512


@functools.lru_cache(maxsize=None)
def _nout_tile():
    return 512 if _vmem_capacity_bytes() >= 100 * 1024 * 1024 else 256


def _round_up(x, m):
    return -(-x // m) * m


def _pick_tile(dim, cap, align):
    """Largest tile <= cap that is a multiple of `align`, preferring exact divisors of dim."""
    if dim <= cap:
        return dim                        # full-dim blocks are always legal
    cap = max(align, (cap // align) * align)
    t = cap
    while t >= align:
        if dim % t == 0:
            return t                      # exact divisor -> no padding pass
        t -= align
    return cap                            # no divisor; caller pads


# ----------------------------- Linear kernels ------------------------------

def _ln_linear_kernel(eps, activation, mxu_dtype, x_ref, g_ref, be_ref, w_ref, b_ref,
                      o_ref, xnorm_ref):
    """LayerNorm fused into a matmul.  Single K step; LN'd row tile cached across Dout tiles."""
    cd = jnp.float32 if mxu_dtype is None else mxu_dtype

    @pl.when(pl.program_id(1) == 0)
    def _():
        x = x_ref[...].astype(jnp.float32)
        mean = jnp.mean(x, axis=-1, keepdims=True)
        var = jnp.mean(jnp.square(x - mean), axis=-1, keepdims=True)
        xn = (x - mean) * lax.rsqrt(var + eps)
        xn = xn * g_ref[...] + be_ref[...]
        xnorm_ref[...] = xn.astype(xnorm_ref.dtype)

    w = w_ref[...]
    if w.dtype != cd:
        w = w.astype(cd)
    acc = jnp.dot(xnorm_ref[...], w, preferred_element_type=jnp.float32)
    acc = acc + b_ref[...]
    if activation == "relu":
        acc = jnp.maximum(acc, 0.0)
    o_ref[...] = acc.astype(o_ref.dtype)


def _linear_kernel(activation, mxu_dtype, single_k, *refs):
    """Plain linear, k-inner reduction with an f32 VMEM accumulator (skipped if single K step)."""
    cd = jnp.float32 if mxu_dtype is None else mxu_dtype
    if single_k:
        x_ref, w_ref, b_ref, o_ref = refs
    else:
        x_ref, w_ref, b_ref, o_ref, acc_ref = refs

    x = x_ref[...]
    if x.dtype != cd:
        x = x.astype(cd)
    w = w_ref[...]
    if w.dtype != cd:
        w = w.astype(cd)
    part = jnp.dot(x, w, preferred_element_type=jnp.float32)

    if single_k:
        acc = part + b_ref[...]
        if activation == "relu":
            acc = jnp.maximum(acc, 0.0)
        o_ref[...] = acc.astype(o_ref.dtype)
    else:
        k = pl.program_id(2)

        @pl.when(k == 0)
        def _():
            acc_ref[...] = jnp.zeros_like(acc_ref)

        acc_ref[...] += part

        @pl.when(k == pl.num_programs(2) - 1)
        def _():
            acc = acc_ref[...] + b_ref[...]
            if activation == "relu":
                acc = jnp.maximum(acc, 0.0)
            o_ref[...] = acc.astype(o_ref.dtype)


def linear_pallas(x2d, w, b, *, ln=None, eps=1e-5, activation=None, mxu_dtype=None,
                  out_dtype=None):
    """y = act(LN(x) @ w + b)  (LN optional).  x2d: (R, Din); w: (Din, Dout); b: (Dout,)."""
    R, Din = x2d.shape
    Dout = w.shape[1]
    out_dtype = x2d.dtype if out_dtype is None else out_dtype
    apply_ln = ln is not None
    cd = jnp.float32 if mxu_dtype is None else mxu_dtype
    limit = _vmem_limit_bytes()

    # --- tile selection ---
    row_cap = _row_tile()
    if apply_ln:
        tk = Din                                  # LN needs the full row in one block
        # guard against VMEM blow-up when Din is large (e.g. w2 with Din = dim_feedforward):
        # x block (double-buffered, input dtype) + cached LN'd tile (compute dtype) per row tile.
        bytes_per_row = Din * (2 * x2d.dtype.itemsize + jnp.dtype(cd).itemsize)
        while row_cap > 8 and row_cap * bytes_per_row > limit // 3:
            row_cap //= 2
        tm = _pick_tile(R, row_cap, 8)
        Kp = Din
    else:
        tm = _pick_tile(R, row_cap, 8)
        tk = _pick_tile(Din, KIN_TILE, 128)
        Kp = _round_up(Din, tk)
    tn = _pick_tile(Dout, _nout_tile(), 128)

    Rp = _round_up(R, tm)
    Dp = _round_up(Dout, tn)
    nk = Kp // tk

    xp = x2d if (Rp == R and Kp == Din) else jnp.pad(x2d, ((0, Rp - R), (0, Kp - Din)))
    wp = w if (Kp == Din and Dp == Dout) else jnp.pad(w, ((0, Kp - Din), (0, Dp - Dout)))
    bp = b.reshape(1, Dout).astype(jnp.float32)
    if Dp != Dout:
        bp = jnp.pad(bp, ((0, 0), (0, Dp - Dout)))

    if apply_ln:
        g, be = ln
        kernel = functools.partial(_ln_linear_kernel, eps, activation, mxu_dtype)
        in_specs = [
            pl.BlockSpec((tm, Din), lambda i, j, k: (i, 0)),
            pl.BlockSpec((1, Din), lambda i, j, k: (0, 0)),
            pl.BlockSpec((1, Din), lambda i, j, k: (0, 0)),
            pl.BlockSpec((Din, tn), lambda i, j, k: (0, j)),
            pl.BlockSpec((1, tn), lambda i, j, k: (0, j)),
        ]
        args = [xp,
                g.reshape(1, Din).astype(jnp.float32),
                be.reshape(1, Din).astype(jnp.float32),
                wp, bp]
        scratch = [pltpu.VMEM((tm, Din), cd)]
        # j must stay on one core: the LN'd row tile cached at j==0 is reused for j>0.
        semantics = ("parallel", "arbitrary", "arbitrary")
    else:
        single_k = nk == 1
        kernel = functools.partial(_linear_kernel, activation, mxu_dtype, single_k)
        in_specs = [
            pl.BlockSpec((tm, tk), lambda i, j, k: (i, k)),
            pl.BlockSpec((tk, tn), lambda i, j, k: (k, j)),
            pl.BlockSpec((1, tn), lambda i, j, k: (0, j)),
        ]
        args = [xp, wp, bp]
        scratch = [] if single_k else [pltpu.VMEM((tm, tn), jnp.float32)]
        semantics = ("parallel", "parallel", "arbitrary")

    out = pl.pallas_call(
        kernel,
        out_shape=jax.ShapeDtypeStruct((Rp, Dp), out_dtype),
        grid=(Rp // tm, Dp // tn, nk),
        in_specs=in_specs,
        out_specs=pl.BlockSpec((tm, tn), lambda i, j, k: (i, j)),
        scratch_shapes=scratch,
        compiler_params=pltpu.CompilerParams(
            dimension_semantics=semantics,
            vmem_limit_bytes=_vmem_limit_bytes(),
        ),
    )(*args)

    if (Rp, Dp) != (R, Dout):
        out = out[:R, :Dout]
    return out


# ----------------------------- batched segment attention kernel ------------------------------

def _segment_attention_kernel(scale, causal, mxu_dtype, q_ref, k_ref, v_ref, o_ref):
    cd = jnp.float32 if mxu_dtype is None else mxu_dtype
    q = q_ref[...]
    k = k_ref[...]
    v = v_ref[...]
    if q.dtype != cd:
        q = q.astype(cd)
    if k.dtype != cd:
        k = k.astype(cd)
    if v.dtype != cd:
        v = v.astype(cd)

    s = jnp.einsum("gqd,gkd->gqk", q, k, preferred_element_type=jnp.float32) * scale
    if causal:
        sq, sk = s.shape[1], s.shape[2]
        iq = lax.broadcasted_iota(jnp.int32, (1, sq, sk), 1)     # broadcast over Gb
        ik = lax.broadcasted_iota(jnp.int32, (1, sq, sk), 2)
        s = jnp.where(ik <= iq + (sk - sq), s, -1e30)            # finite mask: no NaNs

    m = jnp.max(s, axis=-1, keepdims=True)
    p = jnp.exp(s - m)
    denom = jnp.sum(p, axis=-1, keepdims=True)

    o = jnp.einsum("gqk,gkd->gqd", p.astype(cd), v, preferred_element_type=jnp.float32)
    o = o * pl.reciprocal(denom, approx=True)
    o_ref[...] = o.astype(o_ref.dtype)


def _pick_gb(G, Sq, Sk, Dh, itemsize):
    """Slabs per grid step, sized from the VMEM budget; prefer >=2 grid steps and divisors of G."""
    budget = max(_vmem_limit_bytes() // 3, 1 << 20)
    per = (2 * Sq * Sk * 4                           # f32 scores + p
           + 2 * (Sq + 2 * Sk) * Dh * itemsize       # double-buffered q/k/v tiles
           + 2 * Sq * Dh * 4)                        # output tile + f32 result
    gb = max(1, min(G, MAX_G_TILE, budget // per))
    if G >= 2:
        gb = min(gb, -(-G // 2))                     # >= 2 steps so v7x's 2 TCs both get work
    for c in range(gb, 0, -1):                       # exact divisor -> skip the G-padding pass
        if G % c == 0:
            return c
    return gb


def segment_attention_pallas(q, k, v, scale, causal=False, mxu_dtype=None):
    """softmax(Q K^T * scale) V per slab.  q: (G, Sq, Dh); k, v: (G, Sk, Dh)."""
    G, Sq, Dh = q.shape
    Sk = k.shape[1]

    Gb = _pick_gb(G, Sq, Sk, Dh, q.dtype.itemsize)
    Gp = _round_up(G, Gb)
    if Gp != G:
        pad = ((0, Gp - G), (0, 0), (0, 0))
        q, k, v = jnp.pad(q, pad), jnp.pad(k, pad), jnp.pad(v, pad)

    out = pl.pallas_call(
        functools.partial(_segment_attention_kernel, scale, causal, mxu_dtype),
        out_shape=jax.ShapeDtypeStruct((Gp, Sq, Dh), q.dtype),
        grid=(Gp // Gb,),
        in_specs=[
            pl.BlockSpec((Gb, Sq, Dh), lambda g: (g, 0, 0)),
            pl.BlockSpec((Gb, Sk, Dh), lambda g: (g, 0, 0)),
            pl.BlockSpec((Gb, Sk, Dh), lambda g: (g, 0, 0)),
        ],
        out_specs=pl.BlockSpec((Gb, Sq, Dh), lambda g: (g, 0, 0)),
        compiler_params=pltpu.CompilerParams(
            dimension_semantics=("parallel",),
            vmem_limit_bytes=_vmem_limit_bytes(),
        ),
    )(q, k, v)
    return out[:G] if Gp != G else out


# ------------------------- DilatedAttention (glue + kernel) -------------------------

def dilated_attention(q, k, v, segment_lengths, dilation_rates, is_causal=False, mxu_dtype=None):
    """q, k, v: (B, N, H, Dh)  ->  (B, N, H, Dh) in f32.  Mirrors DilatedAttention.forward."""
    b, n, h, d = q.shape
    assert k.shape[1] == n, "dilated attention requires matching query/key lengths"
    num_groups = len(dilation_rates)
    g = h // num_groups  # heads per group
    scale = 1.0 / math.sqrt(d)
    out = jnp.zeros((b, n, h, d), jnp.float32)

    for i, (r, s) in enumerate(zip(dilation_rates, segment_lengths)):
        offset = i % r
        hmin, hmax = i * g, (i + 1) * g
        nseg = n // s

        def fold(x):
            xs = x.reshape(b, nseg, s, h, d)[:, :, offset::r, hmin:hmax, :]   # (b,nseg,sr,g,d)
            sr = xs.shape[2]
            return jnp.transpose(xs, (0, 1, 3, 2, 4)).reshape(b * nseg * g, sr, d), sr

        qf, sr = fold(q)
        kf, _ = fold(k)
        vf, _ = fold(v)

        xg = segment_attention_pallas(qf, kf, vf, scale, causal=is_causal, mxu_dtype=mxu_dtype)
        xg = jnp.transpose(xg.reshape(b, nseg, g, sr, d), (0, 1, 3, 2, 4)).astype(jnp.float32)

        # Reference normalization (DilatedAttention): x = x / x.sum(dim=(1, 2), keepdim=True)
        xg = xg / jnp.sum(xg, axis=(1, 2), keepdims=True)

        # Groups write disjoint head slices of a zero tensor -> pure .set (no read-modify-write).
        out_seg = out.reshape(b, nseg, s, h, d)
        out_seg = out_seg.at[:, :, offset::r, hmin:hmax, :].set(xg)
        out = out_seg.reshape(b, n, h, d)

    return out / num_groups


# ------------------------- Decoder layer forward -------------------------

def dilated_transformer_decoder_layer(params, tgt, memory, *, nhead, segment_lengths,
                                      dilation_rates, layer_norm_eps=1e-5,
                                      tgt_is_causal=False, memory_is_causal=False,
                                      mxu_dtype=jnp.bfloat16):
    B, N, D = tgt.shape
    Bm, Nm, _ = memory.shape
    dh = D // nhead
    x = tgt
    act_dtype = x.dtype if mxu_dtype is None else mxu_dtype   # bf16 attention inputs / FF hidden

    # --- self-attention block: norm1 fused into a single merged QKV projection ---
    p = params["self_attn"]
    qkv = linear_pallas(x.reshape(-1, D), p["wqkv"], p["bqkv"],
                        ln=(params["norm1_g"], params["norm1_b"]),
                        eps=layer_norm_eps, mxu_dtype=mxu_dtype, out_dtype=act_dtype)
    q, k, v = jnp.split(qkv.reshape(B, N, 3 * D), 3, axis=-1)
    a = dilated_attention(q.reshape(B, N, nhead, dh), k.reshape(B, N, nhead, dh),
                          v.reshape(B, N, nhead, dh), segment_lengths, dilation_rates,
                          is_causal=tgt_is_causal, mxu_dtype=mxu_dtype)
    h = linear_pallas(a.reshape(-1, D), p["wo"], p["bo"],
                      mxu_dtype=mxu_dtype, out_dtype=x.dtype)
    x = x + h.reshape(B, N, D)

    # --- cross-attention block: norm2 fused into Q projection, K/V projections merged,
    #     MultiheadDilatedAttention's internal LayerNorm fused into the out projection ---
    p = params["cross_attn"]
    q = linear_pallas(x.reshape(-1, D), p["wq"], p["bq"],
                      ln=(params["norm2_g"], params["norm2_b"]),
                      eps=layer_norm_eps, mxu_dtype=mxu_dtype, out_dtype=act_dtype)
    kv = linear_pallas(memory.reshape(-1, D), p["wkv"], p["bkv"],
                       mxu_dtype=mxu_dtype, out_dtype=act_dtype)
    k, v = jnp.split(kv.reshape(Bm, Nm, 2 * D), 2, axis=-1)
    a = dilated_attention(q.reshape(B, N, nhead, dh), k.reshape(Bm, Nm, nhead, dh),
                          v.reshape(Bm, Nm, nhead, dh), segment_lengths, dilation_rates,
                          is_causal=memory_is_causal, mxu_dtype=mxu_dtype)
    h = linear_pallas(a.reshape(-1, D), p["wo"], p["bo"],
                      ln=(p["ln_g"], p["ln_b"]), eps=layer_norm_eps,
                      mxu_dtype=mxu_dtype, out_dtype=x.dtype)
    x = x + h.reshape(B, N, D)

    # --- feed-forward block: norm3 fused into W1+ReLU, norm4 fused into W2 ---
    hmid = linear_pallas(x.reshape(-1, D), params["w1"], params["b1"],
                         ln=(params["norm3_g"], params["norm3_b"]),
                         eps=layer_norm_eps, activation="relu",
                         mxu_dtype=mxu_dtype, out_dtype=act_dtype)
    h = linear_pallas(hmid, params["w2"], params["b2"],
                      ln=(params["norm4_g"], params["norm4_b"]),
                      eps=layer_norm_eps, mxu_dtype=mxu_dtype, out_dtype=x.dtype)
    x = x + h.reshape(B, N, D)
    return x


# ------------------------- Deterministic parameter init -------------------------

def _xavier(k, fan_in, fan_out, gain, dtype):
    std = gain * math.sqrt(2.0 / (fan_in + fan_out))
    return (std * jax.random.normal(k, (fan_in, fan_out))).astype(dtype)


def init_params(key, d_model, nhead, dim_feedforward, gamma_init=1.0,
                param_dtype=jnp.bfloat16):
    keys = jax.random.split(key, 10)
    f32 = jnp.float32

    def self_attn_params(ks):
        wq = _xavier(ks[0], d_model, d_model, 1.0, param_dtype)
        wk = _xavier(ks[1], d_model, d_model, 1.0, param_dtype)
        wv = _xavier(ks[2], d_model, d_model, gamma_init, param_dtype)
        wo = _xavier(ks[3], d_model, d_model, gamma_init, param_dtype)
        return {
            "wqkv": jnp.concatenate([wq, wk, wv], axis=1),
            "bqkv": jnp.zeros((3 * d_model,), f32),
            "wo": wo, "bo": jnp.zeros((d_model,), f32),
        }

    def cross_attn_params(ks):
        wq = _xavier(ks[0], d_model, d_model, 1.0, param_dtype)
        wk = _xavier(ks[1], d_model, d_model, 1.0, param_dtype)
        wv = _xavier(ks[2], d_model, d_model, gamma_init, param_dtype)
        wo = _xavier(ks[3], d_model, d_model, gamma_init, param_dtype)
        return {
            "wq": wq, "bq": jnp.zeros((d_model,), f32),
            "wkv": jnp.concatenate([wk, wv], axis=1),
            "bkv": jnp.zeros((2 * d_model,), f32),
            "wo": wo, "bo": jnp.zeros((d_model,), f32),
            "ln_g": jnp.ones((d_model,), f32),
            "ln_b": jnp.zeros((d_model,), f32),
        }

    return {
        "norm1_g": jnp.ones((d_model,), f32), "norm1_b": jnp.zeros((d_model,), f32),
        "norm2_g": jnp.ones((d_model,), f32), "norm2_b": jnp.zeros((d_model,), f32),
        "norm3_g": jnp.ones((d_model,), f32), "norm3_b": jnp.zeros((d_model,), f32),
        "norm4_g": jnp.ones((dim_feedforward,), f32),
        "norm4_b": jnp.zeros((dim_feedforward,), f32),
        "self_attn": self_attn_params(keys[0:4]),
        "cross_attn": cross_attn_params(keys[4:8]),
        "w1": _xavier(keys[8], d_model, dim_feedforward, gamma_init, param_dtype),
        "b1": jnp.zeros((dim_feedforward,), f32),
        "w2": _xavier(keys[9], dim_feedforward, d_model, gamma_init, param_dtype),
        "b2": jnp.zeros((d_model,), f32),
    }


# ------------------------- Demo -------------------------

if __name__ == "__main__":
    B, N, D = 2, 8, 32          # batch, seq, d_model  (head_dim = 8)
    NHEAD = 4
    FF = 64                     # dim_feedforward
    SEG = (4, 8)                # segment_lengths
    DIL = (1, 2)                # dilation_rates

    key = jax.random.PRNGKey(0)
    kp, kt, km = jax.random.split(key, 3)
    params = init_params(kp, D, NHEAD, FF, gamma_init=1.0, param_dtype=jnp.bfloat16)
    tgt = jax.random.normal(kt, (B, N, D), dtype=jnp.float32)
    memory = jax.random.normal(km, (B, N, D), dtype=jnp.float32)

    fwd = jax.jit(functools.partial(
        dilated_transformer_decoder_layer,
        nhead=NHEAD, segment_lengths=SEG, dilation_rates=DIL,
        layer_norm_eps=1e-5, tgt_is_causal=False, memory_is_causal=False,
        mxu_dtype=jnp.bfloat16))   # bf16 MXU path with f32 accumulation (set None for f32)

    out = fwd(params, tgt, memory)
    out = jax.block_until_ready(out)
    assert out.shape == (B, N, D)
    assert bool(jnp.all(jnp.isfinite(out)))
    print("KERNEL_OK")
</pallas_src>

<mosaic_0001>
module attributes {stable_mosaic.version = 11 : i64} {
  func.func @_ln_linear_kernel(%arg0: i32, %arg1: i32, %arg2: i32, %arg3: memref<16x32xf32, #tpu.memory_space<vmem>>, %arg4: memref<1x32xf32, #tpu.memory_space<vmem>>, %arg5: memref<1x32xf32, #tpu.memory_space<vmem>>, %arg6: memref<32x96xbf16, #tpu.memory_space<vmem>>, %arg7: memref<1x96xf32, #tpu.memory_space<vmem>>, %arg8: memref<16x96xbf16, #tpu.memory_space<vmem>>, %arg9: memref<16x32xbf16, #tpu.memory_space<vmem>>) attributes {dimension_semantics = [#tpu.dimension_semantics<parallel>, #tpu.dimension_semantics<arbitrary>, #tpu.dimension_semantics<arbitrary>], iteration_bounds = array<i64: 1, 1, 1>, scalar_prefetch = 0 : i64, scratch_operands = 1 : i64, tpu.core_type = #tpu.core_type<tc>, window_params = [{transform_indices = @transform_0, window_bounds = array<i64: 16, 32>}, {pipeline_mode = #tpu.pipeline_mode<synchronous>, transform_indices = @transform_1, window_bounds = array<i64: 1, 32>}, {pipeline_mode = #tpu.pipeline_mode<synchronous>, transform_indices = @transform_2, window_bounds = array<i64: 1, 32>}, {transform_indices = @transform_3, window_bounds = array<i64: 32, 96>}, {transform_indices = @transform_4, window_bounds = array<i64: 1, 96>}, {transform_indices = @transform_5, window_bounds = array<i64: 16, 96>}]} {
    %c0_i32 = arith.constant 0 : i32
    %0 = arith.cmpi eq, %arg1, %c0_i32 : i32
    %1 = arith.extui %0 : i1 to i32
    %c0_i32_0 = arith.constant 0 : i32
    %2 = arith.cmpi ne, %1, %c0_i32_0 : i32
    scf.if %2 {
      %c0_8 = arith.constant 0 : index
      %c0_9 = arith.constant 0 : index
      %11 = vector.load %arg3[%c0_8, %c0_9] : memref<16x32xf32, #tpu.memory_space<vmem>>, vector<16x32xf32>
      %cst_10 = arith.constant dense<0.000000e+00> : vector<16xf32>
      %12 = vector.multi_reduction <add>, %11, %cst_10 [1] : vector<16x32xf32> to vector<16xf32>
      %13 = vector.shape_cast %12 : vector<16xf32> to vector<16x1xf32>
      %cst_11 = arith.constant 3.200000e+01 : f32
      %14 = vector.broadcast %cst_11 : f32 to vector<16x1xf32>
      %15 = arith.divf %13, %14 : vector<16x1xf32>
      %16 = vector.broadcast %15 : vector<16x1xf32> to vector<16x32xf32>
      %17 = arith.subf %11, %16 : vector<16x32xf32>
      %18 = arith.mulf %17, %17 : vector<16x32xf32>
      %cst_12 = arith.constant dense<0.000000e+00> : vector<16xf32>
      %19 = vector.multi_reduction <add>, %18, %cst_12 [1] : vector<16x32xf32> to vector<16xf32>
      %20 = vector.shape_cast %19 : vector<16xf32> to vector<16x1xf32>
      %cst_13 = arith.constant 3.200000e+01 : f32
      %21 = vector.broadcast %cst_13 : f32 to vector<16x1xf32>
      %22 = arith.divf %20, %21 : vector<16x1xf32>
      %23 = vector.broadcast %15 : vector<16x1xf32> to vector<16x32xf32>
      %24 = arith.subf %11, %23 : vector<16x32xf32>
      %cst_14 = arith.constant 9.99999974E-6 : f32
      %25 = vector.broadcast %cst_14 : f32 to vector<16x1xf32>
      %26 = arith.addf %22, %25 : vector<16x1xf32>
      %27 = math.rsqrt %26 : vector<16x1xf32>
      %28 = vector.broadcast %27 : vector<16x1xf32> to vector<16x32xf32>
      %29 = arith.mulf %24, %28 : vector<16x32xf32>
      %c0_15 = arith.constant 0 : index
      %c0_16 = arith.constant 0 : index
      %30 = vector.load %arg4[%c0_15, %c0_16] : memref<1x32xf32, #tpu.memory_space<vmem>>, vector<1x32xf32>
      %31 = vector.broadcast %30 : vector<1x32xf32> to vector<16x32xf32>
      %32 = arith.mulf %29, %31 : vector<16x32xf32>
      %c0_17 = arith.constant 0 : index
      %c0_18 = arith.constant 0 : index
      %33 = vector.load %arg5[%c0_17, %c0_18] : memref<1x32xf32, #tpu.memory_space<vmem>>, vector<1x32xf32>
      %34 = vector.broadcast %33 : vector<1x32xf32> to vector<16x32xf32>
      %35 = arith.addf %32, %34 : vector<16x32xf32>
      %36 = arith.truncf %35 : vector<16x32xf32> to vector<16x32xbf16>
      %c0_19 = arith.constant 0 : index
      %c0_20 = arith.constant 0 : index
      %37 = vector.load %arg9[%c0_19, %c0_20] : memref<16x32xbf16, #tpu.memory_space<vmem>>, vector<16x32xbf16>
      tpu.vector_store %arg9[%c0_19, %c0_20], %36 {strides = array<i32>} : memref<16x32xbf16, #tpu.memory_space<vmem>>, vector<16x32xbf16>,
    } else {
    }
    %c0 = arith.constant 0 : index
    %c0_1 = arith.constant 0 : index
    %3 = vector.load %arg6[%c0, %c0_1] : memref<32x96xbf16, #tpu.memory_space<vmem>>, vector<32x96xbf16>
    %c0_2 = arith.constant 0 : index
    %c0_3 = arith.constant 0 : index
    %4 = vector.load %arg9[%c0_2, %c0_3] : memref<16x32xbf16, #tpu.memory_space<vmem>>, vector<16x32xbf16>
    %cst = arith.constant dense<0.000000e+00> : vector<16x96xf32>
    %5 = tpu.matmul %4, %3, %cst {dimension_numbers = #tpu.dot_dimension_numbers<[1], [0], [0], [1], [0, 0, 1, 1], [], []>} : vector<16x32xbf16>, vector<32x96xbf16>, vector<16x96xf32> -> vector<16x96xf32>
    %c0_4 = arith.constant 0 : index
    %c0_5 = arith.constant 0 : index
    %6 = vector.load %arg7[%c0_4, %c0_5] : memref<1x96xf32, #tpu.memory_space<vmem>>, vector<1x96xf32>
    %7 = vector.broadcast %6 : vector<1x96xf32> to vector<16x96xf32>
    %8 = arith.addf %5, %7 : vector<16x96xf32>
    %9 = arith.truncf %8 : vector<16x96xf32> to vector<16x96xbf16>
    %c0_6 = arith.constant 0 : index
    %c0_7 = arith.constant 0 : index
    %10 = vector.load %arg8[%c0_6, %c0_7] : memref<16x96xbf16, #tpu.memory_space<vmem>>, vector<16x96xbf16>
    tpu.vector_store %arg8[%c0_6, %c0_7], %9 {strides = array<i32>} : memref<16x96xbf16, #tpu.memory_space<vmem>>, vector<16x96xbf16>,
    return
  }
  func.func @transform_0(%arg0: i32, %arg1: i32, %arg2: i32) -> (i32, i32) {
    %c0_i32 = arith.constant 0 : i32
    %c0_i32_0 = arith.constant 0 : i32
    return %arg0, %c0_i32 : i32, i32
  }
  func.func @transform_1(%arg0: i32, %arg1: i32, %arg2: i32) -> (i32, i32) {
    %c0_i32 = arith.constant 0 : i32
    %c0_i32_0 = arith.constant 0 : i32
    %c0_i32_1 = arith.constant 0 : i32
    return %c0_i32, %c0_i32_0 : i32, i32
  }
  func.func @transform_2(%arg0: i32, %arg1: i32, %arg2: i32) -> (i32, i32) {
    %c0_i32 = arith.constant 0 : i32
    %c0_i32_0 = arith.constant 0 : i32
    %c0_i32_1 = arith.constant 0 : i32
    return %c0_i32, %c0_i32_0 : i32, i32
  }
  func.func @transform_3(%arg0: i32, %arg1: i32, %arg2: i32) -> (i32, i32) {
    %c0_i32 = arith.constant 0 : i32
    %c0_i32_0 = arith.constant 0 : i32
    return %c0_i32, %arg1 : i32, i32
  }
  func.func @transform_4(%arg0: i32, %arg1: i32, %arg2: i32) -> (i32, i32) {
    %c0_i32 = arith.constant 0 : i32
    %c0_i32_0 = arith.constant 0 : i32
    return %c0_i32, %arg1 : i32, i32
  }
  func.func @transform_5(%arg0: i32, %arg1: i32, %arg2: i32) -> (i32, i32) {
    %c0_i32 = arith.constant 0 : i32
    return %arg0, %arg1 : i32, i32
  }
}

module attributes {stable_mosaic.version = 11 : i64} {
  func.func @_segment_attention_kernel(%arg0: i32, %arg1: memref<2x4x8xbf16, #tpu.memory_space<vmem>>, %arg2: memref<2x4x8xbf16, #tpu.memory_space<vmem>>, %arg3: memref<2x4x8xbf16, #tpu.memory_space<vmem>>, %arg4: memref<2x4x8xbf16, #tpu.memory_space<vmem>>) attributes {dimension_semantics = [#tpu.dimension_semantics<parallel>], iteration_bounds = array<i64: 2>, scalar_prefetch = 0 : i64, scratch_operands = 0 : i64, tpu.core_type = #tpu.core_type<tc>, window_params = [{transform_indices = @transform_0, window_bounds = array<i64: 2, 4, 8>}, {transform_indices = @transform_1, window_bounds = array<i64: 2, 4, 8>}, {transform_indices = @transform_2, window_bounds = array<i64: 2, 4, 8>}, {transform_indices = @transform_3, window_bounds = array<i64: 2, 4, 8>}]} {
    %c0 = arith.constant 0 : index
    %c0_0 = arith.constant 0 : index
    %c0_1 = arith.constant 0 : index
    %0 = vector.load %arg1[%c0, %c0_0, %c0_1] : memref<2x4x8xbf16, #tpu.memory_space<vmem>>, vector<2x4x8xbf16>
    %c0_2 = arith.constant 0 : index
    %c0_3 = arith.constant 0 : index
    %c0_4 = arith.constant 0 : index
    %1 = vector.load %arg2[%c0_2, %c0_3, %c0_4] : memref<2x4x8xbf16, #tpu.memory_space<vmem>>, vector<2x4x8xbf16>
    %c0_5 = arith.constant 0 : index
    %c0_6 = arith.constant 0 : index
    %c0_7 = arith.constant 0 : index
    %2 = vector.load %arg3[%c0_5, %c0_6, %c0_7] : memref<2x4x8xbf16, #tpu.memory_space<vmem>>, vector<2x4x8xbf16>
    "tpu.trace_start"() <{level = 10 : i32, message = "gqd,gkd->gqk"}> : () -> ()
    %cst = arith.constant dense<0.000000e+00> : vector<2x4x4xf32>
    %3 = tpu.matmul %0, %1, %cst {dimension_numbers = #tpu.dot_dimension_numbers<[2], [2], [1], [1], [0, 0, 0, 1, 1, 1], [0], [0]>} : vector<2x4x8xbf16>, vector<2x4x8xbf16>, vector<2x4x4xf32> -> vector<2x4x4xf32>
    "tpu.trace_stop"() : () -> ()
    %cst_8 = arith.constant 0.353553385 : f32
    %4 = vector.broadcast %cst_8 : f32 to vector<2x4x4xf32>
    %5 = arith.mulf %3, %4 : vector<2x4x4xf32>
    %cst_9 = arith.constant dense<0xFF800000> : vector<2x4xf32>
    %6 = vector.multi_reduction <maximumf>, %5, %cst_9 [2] : vector<2x4x4xf32> to vector<2x4xf32>
    %7 = vector.shape_cast %6 : vector<2x4xf32> to vector<2x4x1xf32>
    %8 = vector.broadcast %7 : vector<2x4x1xf32> to vector<2x4x4xf32>
    %9 = arith.subf %5, %8 : vector<2x4x4xf32>
    %10 = math.exp %9 : vector<2x4x4xf32>
    %cst_10 = arith.constant dense<0.000000e+00> : vector<2x4xf32>
    %11 = vector.multi_reduction <add>, %10, %cst_10 [2] : vector<2x4x4xf32> to vector<2x4xf32>
    %12 = vector.shape_cast %11 : vector<2x4xf32> to vector<2x4x1xf32>
    %13 = arith.truncf %10 : vector<2x4x4xf32> to vector<2x4x4xbf16>
    "tpu.trace_start"() <{level = 10 : i32, message = "gqk,gkd->gqd"}> : () -> ()
    %cst_11 = arith.constant dense<0.000000e+00> : vector<2x4x8xf32>
    %14 = tpu.matmul %13, %2, %cst_11 {dimension_numbers = #tpu.dot_dimension_numbers<[2], [1], [1], [2], [0, 0, 0, 1, 1, 2], [0], [0]>} : vector<2x4x4xbf16>, vector<2x4x8xbf16>, vector<2x4x8xf32> -> vector<2x4x8xf32>
    "tpu.trace_stop"() : () -> ()
    %15 = tpu.reciprocal %12 {approx = true} : vector<2x4x1xf32> -> vector<2x4x1xf32>
    %16 = vector.broadcast %15 : vector<2x4x1xf32> to vector<2x4x8xf32>
    %17 = arith.mulf %14, %16 : vector<2x4x8xf32>
    %18 = arith.truncf %17 : vector<2x4x8xf32> to vector<2x4x8xbf16>
    %c0_12 = arith.constant 0 : index
    %c0_13 = arith.constant 0 : index
    %c0_14 = arith.constant 0 : index
    %19 = vector.load %arg4[%c0_12, %c0_13, %c0_14] : memref<2x4x8xbf16, #tpu.memory_space<vmem>>, vector<2x4x8xbf16>
    tpu.vector_store %arg4[%c0_12, %c0_13, %c0_14], %18 {strides = array<i32>} : memref<2x4x8xbf16, #tpu.memory_space<vmem>>, vector<2x4x8xbf16>,
    return
  }
  func.func @transform_0(%arg0: i32) -> (i32, i32, i32) {
    %c0_i32 = arith.constant 0 : i32
    %c0_i32_0 = arith.constant 0 : i32
    %c0_i32_1 = arith.constant 0 : i32
    return %arg0, %c0_i32, %c0_i32_0 : i32, i32, i32
  }
  func.func @transform_1(%arg0: i32) -> (i32, i32, i32) {
    %c0_i32 = arith.constant 0 : i32
    %c0_i32_0 = arith.constant 0 : i32
    %c0_i32_1 = arith.constant 0 : i32
    return %arg0, %c0_i32, %c0_i32_0 : i32, i32, i32
  }
  func.func @transform_2(%arg0: i32) -> (i32, i32, i32) {
    %c0_i32 = arith.constant 0 : i32
    %c0_i32_0 = arith.constant 0 : i32
    %c0_i32_1 = arith.constant 0 : i32
    return %arg0, %c0_i32, %c0_i32_0 : i32, i32, i32
  }
  func.func @transform_3(%arg0: i32) -> (i32, i32, i32) {
    %c0_i32 = arith.constant 0 : i32
    %c0_i32_0 = arith.constant 0 : i32
    %c0_i32_1 = arith.constant 0 : i32
    return %arg0, %c0_i32, %c0_i32_0 : i32, i32, i32
  }
}

module attributes {stable_mosaic.version = 11 : i64} {
  func.func @_segment_attention_kernel(%arg0: i32, %arg1: memref<4x4x8xbf16, #tpu.memory_space<vmem>>, %arg2: memref<4x4x8xbf16, #tpu.memory_space<vmem>>, %arg3: memref<4x4x8xbf16, #tpu.memory_space<vmem>>, %arg4: memref<4x4x8xbf16, #tpu.memory_space<vmem>>) attributes {dimension_semantics = [#tpu.dimension_semantics<parallel>], iteration_bounds = array<i64: 2>, scalar_prefetch = 0 : i64, scratch_operands = 0 : i64, tpu.core_type = #tpu.core_type<tc>, window_params = [{transform_indices = @transform_0, window_bounds = array<i64: 4, 4, 8>}, {transform_indices = @transform_1, window_bounds = array<i64: 4, 4, 8>}, {transform_indices = @transform_2, window_bounds = array<i64: 4, 4, 8>}, {transform_indices = @transform_3, window_bounds = array<i64: 4, 4, 8>}]} {
    %c0 = arith.constant 0 : index
    %c0_0 = arith.constant 0 : index
    %c0_1 = arith.constant 0 : index
    %0 = vector.load %arg1[%c0, %c0_0, %c0_1] : memref<4x4x8xbf16, #tpu.memory_space<vmem>>, vector<4x4x8xbf16>
    %c0_2 = arith.constant 0 : index
    %c0_3 = arith.constant 0 : index
    %c0_4 = arith.constant 0 : index
    %1 = vector.load %arg2[%c0_2, %c0_3, %c0_4] : memref<4x4x8xbf16, #tpu.memory_space<vmem>>, vector<4x4x8xbf16>
    %c0_5 = arith.constant 0 : index
    %c0_6 = arith.constant 0 : index
    %c0_7 = arith.constant 0 : index
    %2 = vector.load %arg3[%c0_5, %c0_6, %c0_7] : memref<4x4x8xbf16, #tpu.memory_space<vmem>>, vector<4x4x8xbf16>
    "tpu.trace_start"() <{level = 10 : i32, message = "gqd,gkd->gqk"}> : () -> ()
    %cst = arith.constant dense<0.000000e+00> : vector<4x4x4xf32>
    %3 = tpu.matmul %0, %1, %cst {dimension_numbers = #tpu.dot_dimension_numbers<[2], [2], [1], [1], [0, 0, 0, 1, 1, 1], [0], [0]>} : vector<4x4x8xbf16>, vector<4x4x8xbf16>, vector<4x4x4xf32> -> vector<4x4x4xf32>
    "tpu.trace_stop"() : () -> ()
    %cst_8 = arith.constant 0.353553385 : f32
    %4 = vector.broadcast %cst_8 : f32 to vector<4x4x4xf32>
    %5 = arith.mulf %3, %4 : vector<4x4x4xf32>
    %cst_9 = arith.constant dense<0xFF800000> : vector<4x4xf32>
    %6 = vector.multi_reduction <maximumf>, %5, %cst_9 [2] : vector<4x4x4xf32> to vector<4x4xf32>
    %7 = vector.shape_cast %6 : vector<4x4xf32> to vector<4x4x1xf32>
    %8 = vector.broadcast %7 : vector<4x4x1xf32> to vector<4x4x4xf32>
    %9 = arith.subf %5, %8 : vector<4x4x4xf32>
    %10 = math.exp %9 : vector<4x4x4xf32>
    %cst_10 = arith.constant dense<0.000000e+00> : vector<4x4xf32>
    %11 = vector.multi_reduction <add>, %10, %cst_10 [2] : vector<4x4x4xf32> to vector<4x4xf32>
    %12 = vector.shape_cast %11 : vector<4x4xf32> to vector<4x4x1xf32>
    %13 = arith.truncf %10 : vector<4x4x4xf32> to vector<4x4x4xbf16>
    "tpu.trace_start"() <{level = 10 : i32, message = "gqk,gkd->gqd"}> : () -> ()
    %cst_11 = arith.constant dense<0.000000e+00> : vector<4x4x8xf32>
    %14 = tpu.matmul %13, %2, %cst_11 {dimension_numbers = #tpu.dot_dimension_numbers<[2], [1], [1], [2], [0, 0, 0, 1, 1, 2], [0], [0]>} : vector<4x4x4xbf16>, vector<4x4x8xbf16>, vector<4x4x8xf32> -> vector<4x4x8xf32>
    "tpu.trace_stop"() : () -> ()
    %15 = tpu.reciprocal %12 {approx = true} : vector<4x4x1xf32> -> vector<4x4x1xf32>
    %16 = vector.broadcast %15 : vector<4x4x1xf32> to vector<4x4x8xf32>
    %17 = arith.mulf %14, %16 : vector<4x4x8xf32>
    %18 = arith.truncf %17 : vector<4x4x8xf32> to vector<4x4x8xbf16>
    %c0_12 = arith.constant 0 : index
    %c0_13 = arith.constant 0 : index
    %c0_14 = arith.constant 0 : index
    %19 = vector.load %arg4[%c0_12, %c0_13, %c0_14] : memref<4x4x8xbf16, #tpu.memory_space<vmem>>, vector<4x4x8xbf16>
    tpu.vector_store %arg4[%c0_12, %c0_13, %c0_14], %18 {strides = array<i32>} : memref<4x4x8xbf16, #tpu.memory_space<vmem>>, vector<4x4x8xbf16>,
    return
  }
  func.func @transform_0(%arg0: i32) -> (i32, i32, i32) {
    %c0_i32 = arith.constant 0 : i32
    %c0_i32_0 = arith.constant 0 : i32
    %c0_i32_1 = arith.constant 0 : i32
    return %arg0, %c0_i32, %c0_i32_0 : i32, i32, i32
  }
  func.func @transform_1(%arg0: i32) -> (i32, i32, i32) {
    %c0_i32 = arith.constant 0 : i32
    %c0_i32_0 = arith.constant 0 : i32
    %c0_i32_1 = arith.constant 0 : i32
    return %arg0, %c0_i32, %c0_i32_0 : i32, i32, i32
  }
  func.func @transform_2(%arg0: i32) -> (i32, i32, i32) {
    %c0_i32 = arith.constant 0 : i32
    %c0_i32_0 = arith.constant 0 : i32
    %c0_i32_1 = arith.constant 0 : i32
    return %arg0, %c0_i32, %c0_i32_0 : i32, i32, i32
  }
  func.func @transform_3(%arg0: i32) -> (i32, i32, i32) {
    %c0_i32 = arith.constant 0 : i32
    %c0_i32_0 = arith.constant 0 : i32
    %c0_i32_1 = arith.constant 0 : i32
    return %arg0, %c0_i32, %c0_i32_0 : i32, i32, i32
  }
}

module attributes {stable_mosaic.version = 11 : i64} {
  func.func @_linear_kernel(%arg0: i32, %arg1: i32, %arg2: i32, %arg3: memref<16x32xf32, #tpu.memory_space<vmem>>, %arg4: memref<32x32xbf16, #tpu.memory_space<vmem>>, %arg5: memref<1x32xf32, #tpu.memory_space<vmem>>, %arg6: memref<16x32xf32, #tpu.memory_space<vmem>>) attributes {dimension_semantics = [#tpu.dimension_semantics<parallel>, #tpu.dimension_semantics<parallel>, #tpu.dimension_semantics<arbitrary>], iteration_bounds = array<i64: 1, 1, 1>, scalar_prefetch = 0 : i64, scratch_operands = 0 : i64, tpu.core_type = #tpu.core_type<tc>, window_params = [{transform_indices = @transform_0, window_bounds = array<i64: 16, 32>}, {transform_indices = @transform_1, window_bounds = array<i64: 32, 32>}, {transform_indices = @transform_2, window_bounds = array<i64: 1, 32>}, {transform_indices = @transform_3, window_bounds = array<i64: 16, 32>}]} {
    %c0 = arith.constant 0 : index
    %c0_0 = arith.constant 0 : index
    %0 = vector.load %arg3[%c0, %c0_0] : memref<16x32xf32, #tpu.memory_space<vmem>>, vector<16x32xf32>
    %1 = arith.truncf %0 : vector<16x32xf32> to vector<16x32xbf16>
    %c0_1 = arith.constant 0 : index
    %c0_2 = arith.constant 0 : index
    %2 = vector.load %arg4[%c0_1, %c0_2] : memref<32x32xbf16, #tpu.memory_space<vmem>>, vector<32x32xbf16>
    %cst = arith.constant dense<0.000000e+00> : vector<16x32xf32>
    %3 = tpu.matmul %1, %2, %cst {dimension_numbers = #tpu.dot_dimension_numbers<[1], [0], [0], [1], [0, 0, 1, 1], [], []>} : vector<16x32xbf16>, vector<32x32xbf16>, vector<16x32xf32> -> vector<16x32xf32>
    %c0_3 = arith.constant 0 : index
    %c0_4 = arith.constant 0 : index
    %4 = vector.load %arg5[%c0_3, %c0_4] : memref<1x32xf32, #tpu.memory_space<vmem>>, vector<1x32xf32>
    %5 = vector.broadcast %4 : vector<1x32xf32> to vector<16x32xf32>
    %6 = arith.addf %3, %5 : vector<16x32xf32>
    %c0_5 = arith.constant 0 : index
    %c0_6 = arith.constant 0 : index
    %7 = vector.load %arg6[%c0_5, %c0_6] : memref<16x32xf32, #tpu.memory_space<vmem>>, vector<16x32xf32>
    tpu.vector_store %arg6[%c0_5, %c0_6], %6 {strides = array<i32>} : memref<16x32xf32, #tpu.memory_space<vmem>>, vector<16x32xf32>,
    return
  }
  func.func @transform_0(%arg0: i32, %arg1: i32, %arg2: i32) -> (i32, i32) {
    %c0_i32 = arith.constant 0 : i32
    return %arg0, %arg2 : i32, i32
  }
  func.func @transform_1(%arg0: i32, %arg1: i32, %arg2: i32) -> (i32, i32) {
    %c0_i32 = arith.constant 0 : i32
    return %arg2, %arg1 : i32, i32
  }
  func.func @transform_2(%arg0: i32, %arg1: i32, %arg2: i32) -> (i32, i32) {
    %c0_i32 = arith.constant 0 : i32
    %c0_i32_0 = arith.constant 0 : i32
    return %c0_i32, %arg1 : i32, i32
  }
  func.func @transform_3(%arg0: i32, %arg1: i32, %arg2: i32) -> (i32, i32) {
    %c0_i32 = arith.constant 0 : i32
    return %arg0, %arg1 : i32, i32
  }
}

module attributes {stable_mosaic.version = 11 : i64} {
  func.func @_ln_linear_kernel(%arg0: i32, %arg1: i32, %arg2: i32, %arg3: memref<16x32xf32, #tpu.memory_space<vmem>>, %arg4: memref<1x32xf32, #tpu.memory_space<vmem>>, %arg5: memref<1x32xf32, #tpu.memory_space<vmem>>, %arg6: memref<32x32xbf16, #tpu.memory_space<vmem>>, %arg7: memref<1x32xf32, #tpu.memory_space<vmem>>, %arg8: memref<16x32xbf16, #tpu.memory_space<vmem>>, %arg9: memref<16x32xbf16, #tpu.memory_space<vmem>>) attributes {dimension_semantics = [#tpu.dimension_semantics<parallel>, #tpu.dimension_semantics<arbitrary>, #tpu.dimension_semantics<arbitrary>], iteration_bounds = array<i64: 1, 1, 1>, scalar_prefetch = 0 : i64, scratch_operands = 1 : i64, tpu.core_type = #tpu.core_type<tc>, window_params = [{transform_indices = @transform_0, window_bounds = array<i64: 16, 32>}, {pipeline_mode = #tpu.pipeline_mode<synchronous>, transform_indices = @transform_1, window_bounds = array<i64: 1, 32>}, {pipeline_mode = #tpu.pipeline_mode<synchronous>, transform_indices = @transform_2, window_bounds = array<i64: 1, 32>}, {transform_indices = @transform_3, window_bounds = array<i64: 32, 32>}, {transform_indices = @transform_4, window_bounds = array<i64: 1, 32>}, {transform_indices = @transform_5, window_bounds = array<i64: 16, 32>}]} {
    %c0_i32 = arith.constant 0 : i32
    %0 = arith.cmpi eq, %arg1, %c0_i32 : i32
    %1 = arith.extui %0 : i1 to i32
    %c0_i32_0 = arith.constant 0 : i32
    %2 = arith.cmpi ne, %1, %c0_i32_0 : i32
    scf.if %2 {
      %c0_8 = arith.constant 0 : index
      %c0_9 = arith.constant 0 : index
      %11 = vector.load %arg3[%c0_8, %c0_9] : memref<16x32xf32, #tpu.memory_space<vmem>>, vector<16x32xf32>
      %cst_10 = arith.constant dense<0.000000e+00> : vector<16xf32>
      %12 = vector.multi_reduction <add>, %11, %cst_10 [1] : vector<16x32xf32> to vector<16xf32>
      %13 = vector.shape_cast %12 : vector<16xf32> to vector<16x1xf32>
      %cst_11 = arith.constant 3.200000e+01 : f32
      %14 = vector.broadcast %cst_11 : f32 to vector<16x1xf32>
      %15 = arith.divf %13, %14 : vector<16x1xf32>
      %16 = vector.broadcast %15 : vector<16x1xf32> to vector<16x32xf32>
      %17 = arith.subf %11, %16 : vector<16x32xf32>
      %18 = arith.mulf %17, %17 : vector<16x32xf32>
      %cst_12 = arith.constant dense<0.000000e+00> : vector<16xf32>
      %19 = vector.multi_reduction <add>, %18, %cst_12 [1] : vector<16x32xf32> to vector<16xf32>
      %20 = vector.shape_cast %19 : vector<16xf32> to vector<16x1xf32>
      %cst_13 = arith.constant 3.200000e+01 : f32
      %21 = vector.broadcast %cst_13 : f32 to vector<16x1xf32>
      %22 = arith.divf %20, %21 : vector<16x1xf32>
      %23 = vector.broadcast %15 : vector<16x1xf32> to vector<16x32xf32>
      %24 = arith.subf %11, %23 : vector<16x32xf32>
      %cst_14 = arith.constant 9.99999974E-6 : f32
      %25 = vector.broadcast %cst_14 : f32 to vector<16x1xf32>
      %26 = arith.addf %22, %25 : vector<16x1xf32>
      %27 = math.rsqrt %26 : vector<16x1xf32>
      %28 = vector.broadcast %27 : vector<16x1xf32> to vector<16x32xf32>
      %29 = arith.mulf %24, %28 : vector<16x32xf32>
      %c0_15 = arith.constant 0 : index
      %c0_16 = arith.constant 0 : index
      %30 = vector.load %arg4[%c0_15, %c0_16] : memref<1x32xf32, #tpu.memory_space<vmem>>, vector<1x32xf32>
      %31 = vector.broadcast %30 : vector<1x32xf32> to vector<16x32xf32>
      %32 = arith.mulf %29, %31 : vector<16x32xf32>
      %c0_17 = arith.constant 0 : index
      %c0_18 = arith.constant 0 : index
      %33 = vector.load %arg5[%c0_17, %c0_18] : memref<1x32xf32, #tpu.memory_space<vmem>>, vector<1x32xf32>
      %34 = vector.broadcast %33 : vector<1x32xf32> to vector<16x32xf32>
      %35 = arith.addf %32, %34 : vector<16x32xf32>
      %36 = arith.truncf %35 : vector<16x32xf32> to vector<16x32xbf16>
      %c0_19 = arith.constant 0 : index
      %c0_20 = arith.constant 0 : index
      %37 = vector.load %arg9[%c0_19, %c0_20] : memref<16x32xbf16, #tpu.memory_space<vmem>>, vector<16x32xbf16>
      tpu.vector_store %arg9[%c0_19, %c0_20], %36 {strides = array<i32>} : memref<16x32xbf16, #tpu.memory_space<vmem>>, vector<16x32xbf16>,
    } else {
    }
    %c0 = arith.constant 0 : index
    %c0_1 = arith.constant 0 : index
    %3 = vector.load %arg6[%c0, %c0_1] : memref<32x32xbf16, #tpu.memory_space<vmem>>, vector<32x32xbf16>
    %c0_2 = arith.constant 0 : index
    %c0_3 = arith.constant 0 : index
    %4 = vector.load %arg9[%c0_2, %c0_3] : memref<16x32xbf16, #tpu.memory_space<vmem>>, vector<16x32xbf16>
    %cst = arith.constant dense<0.000000e+00> : vector<16x32xf32>
    %5 = tpu.matmul %4, %3, %cst {dimension_numbers = #tpu.dot_dimension_numbers<[1], [0], [0], [1], [0, 0, 1, 1], [], []>} : vector<16x32xbf16>, vector<32x32xbf16>, vector<16x32xf32> -> vector<16x32xf32>
    %c0_4 = arith.constant 0 : index
    %c0_5 = arith.constant 0 : index
    %6 = vector.load %arg7[%c0_4, %c0_5] : memref<1x32xf32, #tpu.memory_space<vmem>>, vector<1x32xf32>
    %7 = vector.broadcast %6 : vector<1x32xf32> to vector<16x32xf32>
    %8 = arith.addf %5, %7 : vector<16x32xf32>
    %9 = arith.truncf %8 : vector<16x32xf32> to vector<16x32xbf16>
    %c0_6 = arith.constant 0 : index
    %c0_7 = arith.constant 0 : index
    %10 = vector.load %arg8[%c0_6, %c0_7] : memref<16x32xbf16, #tpu.memory_space<vmem>>, vector<16x32xbf16>
    tpu.vector_store %arg8[%c0_6, %c0_7], %9 {strides = array<i32>} : memref<16x32xbf16, #tpu.memory_space<vmem>>, vector<16x32xbf16>,
    return
  }
  func.func @transform_0(%arg0: i32, %arg1: i32, %arg2: i32) -> (i32, i32) {
    %c0_i32 = arith.constant 0 : i32
    %c0_i32_0 = arith.constant 0 : i32
    return %arg0, %c0_i32 : i32, i32
  }
  func.func @transform_1(%arg0: i32, %arg1: i32, %arg2: i32) -> (i32, i32) {
    %c0_i32 = arith.constant 0 : i32
    %c0_i32_0 = arith.constant 0 : i32
    %c0_i32_1 = arith.constant 0 : i32
    return %c0_i32, %c0_i32_0 : i32, i32
  }
  func.func @transform_2(%arg0: i32, %arg1: i32, %arg2: i32) -> (i32, i32) {
    %c0_i32 = arith.constant 0 : i32
    %c0_i32_0 = arith.constant 0 : i32
    %c0_i32_1 = arith.constant 0 : i32
    return %c0_i32, %c0_i32_0 : i32, i32
  }
  func.func @transform_3(%arg0: i32, %arg1: i32, %arg2: i32) -> (i32, i32) {
    %c0_i32 = arith.constant 0 : i32
    %c0_i32_0 = arith.constant 0 : i32
    return %c0_i32, %arg1 : i32, i32
  }
  func.func @transform_4(%arg0: i32, %arg1: i32, %arg2: i32) -> (i32, i32) {
    %c0_i32 = arith.constant 0 : i32
    %c0_i32_0 = arith.constant 0 : i32
    return %c0_i32, %arg1 : i32, i32
  }
  func.func @transform_5(%arg0: i32, %arg1: i32, %arg2: i32) -> (i32, i32) {
    %c0_i32 = arith.constant 0 : i32
    return %arg0, %arg1 : i32, i32
  }
}

module attributes {stable_mosaic.version = 11 : i64} {
  func.func @_ln_linear_kernel(%arg0: i32, %arg1: i32, %arg2: i32, %arg3: memref<16x32xf32, #tpu.memory_space<vmem>>, %arg4: memref<1x32xf32, #tpu.memory_space<vmem>>, %arg5: memref<1x32xf32, #tpu.memory_space<vmem>>, %arg6: memref<32x32xbf16, #tpu.memory_space<vmem>>, %arg7: memref<1x32xf32, #tpu.memory_space<vmem>>, %arg8: memref<16x32xf32, #tpu.memory_space<vmem>>, %arg9: memref<16x32xbf16, #tpu.memory_space<vmem>>) attributes {dimension_semantics = [#tpu.dimension_semantics<parallel>, #tpu.dimension_semantics<arbitrary>, #tpu.dimension_semantics<arbitrary>], iteration_bounds = array<i64: 1, 1, 1>, scalar_prefetch = 0 : i64, scratch_operands = 1 : i64, tpu.core_type = #tpu.core_type<tc>, window_params = [{transform_indices = @transform_0, window_bounds = array<i64: 16, 32>}, {pipeline_mode = #tpu.pipeline_mode<synchronous>, transform_indices = @transform_1, window_bounds = array<i64: 1, 32>}, {pipeline_mode = #tpu.pipeline_mode<synchronous>, transform_indices = @transform_2, window_bounds = array<i64: 1, 32>}, {transform_indices = @transform_3, window_bounds = array<i64: 32, 32>}, {transform_indices = @transform_4, window_bounds = array<i64: 1, 32>}, {transform_indices = @transform_5, window_bounds = array<i64: 16, 32>}]} {
    %c0_i32 = arith.constant 0 : i32
    %0 = arith.cmpi eq, %arg1, %c0_i32 : i32
    %1 = arith.extui %0 : i1 to i32
    %c0_i32_0 = arith.constant 0 : i32
    %2 = arith.cmpi ne, %1, %c0_i32_0 : i32
    scf.if %2 {
      %c0_8 = arith.constant 0 : index
      %c0_9 = arith.constant 0 : index
      %10 = vector.load %arg3[%c0_8, %c0_9] : memref<16x32xf32, #tpu.memory_space<vmem>>, vector<16x32xf32>
      %cst_10 = arith.constant dense<0.000000e+00> : vector<16xf32>
      %11 = vector.multi_reduction <add>, %10, %cst_10 [1] : vector<16x32xf32> to vector<16xf32>
      %12 = vector.shape_cast %11 : vector<16xf32> to vector<16x1xf32>
      %cst_11 = arith.constant 3.200000e+01 : f32
      %13 = vector.broadcast %cst_11 : f32 to vector<16x1xf32>
      %14 = arith.divf %12, %13 : vector<16x1xf32>
      %15 = vector.broadcast %14 : vector<16x1xf32> to vector<16x32xf32>
      %16 = arith.subf %10, %15 : vector<16x32xf32>
      %17 = arith.mulf %16, %16 : vector<16x32xf32>
      %cst_12 = arith.constant dense<0.000000e+00> : vector<16xf32>
      %18 = vector.multi_reduction <add>, %17, %cst_12 [1] : vector<16x32xf32> to vector<16xf32>
      %19 = vector.shape_cast %18 : vector<16xf32> to vector<16x1xf32>
      %cst_13 = arith.constant 3.200000e+01 : f32
      %20 = vector.broadcast %cst_13 : f32 to vector<16x1xf32>
      %21 = arith.divf %19, %20 : vector<16x1xf32>
      %22 = vector.broadcast %14 : vector<16x1xf32> to vector<16x32xf32>
      %23 = arith.subf %10, %22 : vector<16x32xf32>
      %cst_14 = arith.constant 9.99999974E-6 : f32
      %24 = vector.broadcast %cst_14 : f32 to vector<16x1xf32>
      %25 = arith.addf %21, %24 : vector<16x1xf32>
      %26 = math.rsqrt %25 : vector<16x1xf32>
      %27 = vector.broadcast %26 : vector<16x1xf32> to vector<16x32xf32>
      %28 = arith.mulf %23, %27 : vector<16x32xf32>
      %c0_15 = arith.constant 0 : index
      %c0_16 = arith.constant 0 : index
      %29 = vector.load %arg4[%c0_15, %c0_16] : memref<1x32xf32, #tpu.memory_space<vmem>>, vector<1x32xf32>
      %30 = vector.broadcast %29 : vector<1x32xf32> to vector<16x32xf32>
      %31 = arith.mulf %28, %30 : vector<16x32xf32>
      %c0_17 = arith.constant 0 : index
      %c0_18 = arith.constant 0 : index
      %32 = vector.load %arg5[%c0_17, %c0_18] : memref<1x32xf32, #tpu.memory_space<vmem>>, vector<1x32xf32>
      %33 = vector.broadcast %32 : vector<1x32xf32> to vector<16x32xf32>
      %34 = arith.addf %31, %33 : vector<16x32xf32>
      %35 = arith.truncf %34 : vector<16x32xf32> to vector<16x32xbf16>
      %c0_19 = arith.constant 0 : index
      %c0_20 = arith.constant 0 : index
      %36 = vector.load %arg9[%c0_19, %c0_20] : memref<16x32xbf16, #tpu.memory_space<vmem>>, vector<16x32xbf16>
      tpu.vector_store %arg9[%c0_19, %c0_20], %35 {strides = array<i32>} : memref<16x32xbf16, #tpu.memory_space<vmem>>, vector<16x32xbf16>,
    } else {
    }
    %c0 = arith.constant 0 : index
    %c0_1 = arith.constant 0 : index
    %3 = vector.load %arg6[%c0, %c0_1] : memref<32x32xbf16, #tpu.memory_space<vmem>>, vector<32x32xbf16>
    %c0_2 = arith.constant 0 : index
    %c0_3 = arith.constant 0 : index
    %4 = vector.load %arg9[%c0_2, %c0_3] : memref<16x32xbf16, #tpu.memory_space<vmem>>, vector<16x32xbf16>
    %cst = arith.constant dense<0.000000e+00> : vector<16x32xf32>
    %5 = tpu.matmul %4, %3, %cst {dimension_numbers = #tpu.dot_dimension_numbers<[1], [0], [0], [1], [0, 0, 1, 1], [], []>} : vector<16x32xbf16>, vector<32x32xbf16>, vector<16x32xf32> -> vector<16x32xf32>
    %c0_4 = arith.constant 0 : index
    %c0_5 = arith.constant 0 : index
    %6 = vector.load %arg7[%c0_4, %c0_5] : memref<1x32xf32, #tpu.memory_space<vmem>>, vector<1x32xf32>
    %7 = vector.broadcast %6 : vector<1x32xf32> to vector<16x32xf32>
    %8 = arith.addf %5, %7 : vector<16x32xf32>
    %c0_6 = arith.constant 0 : index
    %c0_7 = arith.constant 0 : index
    %9 = vector.load %arg8[%c0_6, %c0_7] : memref<16x32xf32, #tpu.memory_space<vmem>>, vector<16x32xf32>
    tpu.vector_store %arg8[%c0_6, %c0_7], %8 {strides = array<i32>} : memref<16x32xf32, #tpu.memory_space<vmem>>, vector<16x32xf32>,
    return
  }
  func.func @transform_0(%arg0: i32, %arg1: i32, %arg2: i32) -> (i32, i32) {
    %c0_i32 = arith.constant 0 : i32
    %c0_i32_0 = arith.constant 0 : i32
    return %arg0, %c0_i32 : i32, i32
  }
  func.func @transform_1(%arg0: i32, %arg1: i32, %arg2: i32) -> (i32, i32) {
    %c0_i32 = arith.constant 0 : i32
    %c0_i32_0 = arith.constant 0 : i32
    %c0_i32_1 = arith.constant 0 : i32
    return %c0_i32, %c0_i32_0 : i32, i32
  }
  func.func @transform_2(%arg0: i32, %arg1: i32, %arg2: i32) -> (i32, i32) {
    %c0_i32 = arith.constant 0 : i32
    %c0_i32_0 = arith.constant 0 : i32
    %c0_i32_1 = arith.constant 0 : i32
    return %c0_i32, %c0_i32_0 : i32, i32
  }
  func.func @transform_3(%arg0: i32, %arg1: i32, %arg2: i32) -> (i32, i32) {
    %c0_i32 = arith.constant 0 : i32
    %c0_i32_0 = arith.constant 0 : i32
    return %c0_i32, %arg1 : i32, i32
  }
  func.func @transform_4(%arg0: i32, %arg1: i32, %arg2: i32) -> (i32, i32) {
    %c0_i32 = arith.constant 0 : i32
    %c0_i32_0 = arith.constant 0 : i32
    return %c0_i32, %arg1 : i32, i32
  }
  func.func @transform_5(%arg0: i32, %arg1: i32, %arg2: i32) -> (i32, i32) {
    %c0_i32 = arith.constant 0 : i32
    return %arg0, %arg1 : i32, i32
  }
}

module attributes {stable_mosaic.version = 11 : i64} {
  func.func @_linear_kernel(%arg0: i32, %arg1: i32, %arg2: i32, %arg3: memref<16x32xf32, #tpu.memory_space<vmem>>, %arg4: memref<32x64xbf16, #tpu.memory_space<vmem>>, %arg5: memref<1x64xf32, #tpu.memory_space<vmem>>, %arg6: memref<16x64xbf16, #tpu.memory_space<vmem>>) attributes {dimension_semantics = [#tpu.dimension_semantics<parallel>, #tpu.dimension_semantics<parallel>, #tpu.dimension_semantics<arbitrary>], iteration_bounds = array<i64: 1, 1, 1>, scalar_prefetch = 0 : i64, scratch_operands = 0 : i64, tpu.core_type = #tpu.core_type<tc>, window_params = [{transform_indices = @transform_0, window_bounds = array<i64: 16, 32>}, {transform_indices = @transform_1, window_bounds = array<i64: 32, 64>}, {transform_indices = @transform_2, window_bounds = array<i64: 1, 64>}, {transform_indices = @transform_3, window_bounds = array<i64: 16, 64>}]} {
    %c0 = arith.constant 0 : index
    %c0_0 = arith.constant 0 : index
    %0 = vector.load %arg3[%c0, %c0_0] : memref<16x32xf32, #tpu.memory_space<vmem>>, vector<16x32xf32>
    %1 = arith.truncf %0 : vector<16x32xf32> to vector<16x32xbf16>
    %c0_1 = arith.constant 0 : index
    %c0_2 = arith.constant 0 : index
    %2 = vector.load %arg4[%c0_1, %c0_2] : memref<32x64xbf16, #tpu.memory_space<vmem>>, vector<32x64xbf16>
    %cst = arith.constant dense<0.000000e+00> : vector<16x64xf32>
    %3 = tpu.matmul %1, %2, %cst {dimension_numbers = #tpu.dot_dimension_numbers<[1], [0], [0], [1], [0, 0, 1, 1], [], []>} : vector<16x32xbf16>, vector<32x64xbf16>, vector<16x64xf32> -> vector<16x64xf32>
    %c0_3 = arith.constant 0 : index
    %c0_4 = arith.constant 0 : index
    %4 = vector.load %arg5[%c0_3, %c0_4] : memref<1x64xf32, #tpu.memory_space<vmem>>, vector<1x64xf32>
    %5 = vector.broadcast %4 : vector<1x64xf32> to vector<16x64xf32>
    %6 = arith.addf %3, %5 : vector<16x64xf32>
    %7 = arith.truncf %6 : vector<16x64xf32> to vector<16x64xbf16>
    %c0_5 = arith.constant 0 : index
    %c0_6 = arith.constant 0 : index
    %8 = vector.load %arg6[%c0_5, %c0_6] : memref<16x64xbf16, #tpu.memory_space<vmem>>, vector<16x64xbf16>
    tpu.vector_store %arg6[%c0_5, %c0_6], %7 {strides = array<i32>} : memref<16x64xbf16, #tpu.memory_space<vmem>>, vector<16x64xbf16>,
    return
  }
  func.func @transform_0(%arg0: i32, %arg1: i32, %arg2: i32) -> (i32, i32) {
    %c0_i32 = arith.constant 0 : i32
    return %arg0, %arg2 : i32, i32
  }
  func.func @transform_1(%arg0: i32, %arg1: i32, %arg2: i32) -> (i32, i32) {
    %c0_i32 = arith.constant 0 : i32
    return %arg2, %arg1 : i32, i32
  }
  func.func @transform_2(%arg0: i32, %arg1: i32, %arg2: i32) -> (i32, i32) {
    %c0_i32 = arith.constant 0 : i32
    %c0_i32_0 = arith.constant 0 : i32
    return %c0_i32, %arg1 : i32, i32
  }
  func.func @transform_3(%arg0: i32, %arg1: i32, %arg2: i32) -> (i32, i32) {
    %c0_i32 = arith.constant 0 : i32
    return %arg0, %arg1 : i32, i32
  }
}

module attributes {stable_mosaic.version = 11 : i64} {
  func.func @_ln_linear_kernel(%arg0: i32, %arg1: i32, %arg2: i32, %arg3: memref<16x64xbf16, #tpu.memory_space<vmem>>, %arg4: memref<1x64xf32, #tpu.memory_space<vmem>>, %arg5: memref<1x64xf32, #tpu.memory_space<vmem>>, %arg6: memref<64x32xbf16, #tpu.memory_space<vmem>>, %arg7: memref<1x32xf32, #tpu.memory_space<vmem>>, %arg8: memref<16x32xf32, #tpu.memory_space<vmem>>, %arg9: memref<16x64xbf16, #tpu.memory_space<vmem>>) attributes {dimension_semantics = [#tpu.dimension_semantics<parallel>, #tpu.dimension_semantics<arbitrary>, #tpu.dimension_semantics<arbitrary>], iteration_bounds = array<i64: 1, 1, 1>, scalar_prefetch = 0 : i64, scratch_operands = 1 : i64, tpu.core_type = #tpu.core_type<tc>, window_params = [{transform_indices = @transform_0, window_bounds = array<i64: 16, 64>}, {pipeline_mode = #tpu.pipeline_mode<synchronous>, transform_indices = @transform_1, window_bounds = array<i64: 1, 64>}, {pipeline_mode = #tpu.pipeline_mode<synchronous>, transform_indices = @transform_2, window_bounds = array<i64: 1, 64>}, {transform_indices = @transform_3, window_bounds = array<i64: 64, 32>}, {transform_indices = @transform_4, window_bounds = array<i64: 1, 32>}, {transform_indices = @transform_5, window_bounds = array<i64: 16, 32>}]} {
    %c0_i32 = arith.constant 0 : i32
    %0 = arith.cmpi eq, %arg1, %c0_i32 : i32
    %1 = arith.extui %0 : i1 to i32
    %c0_i32_0 = arith.constant 0 : i32
    %2 = arith.cmpi ne, %1, %c0_i32_0 : i32
    scf.if %2 {
      %c0_8 = arith.constant 0 : index
      %c0_9 = arith.constant 0 : index
      %10 = vector.load %arg3[%c0_8, %c0_9] : memref<16x64xbf16, #tpu.memory_space<vmem>>, vector<16x64xbf16>
      %11 = arith.extf %10 : vector<16x64xbf16> to vector<16x64xf32>
      %cst_10 = arith.constant dense<0.000000e+00> : vector<16xf32>
      %12 = vector.multi_reduction <add>, %11, %cst_10 [1] : vector<16x64xf32> to vector<16xf32>
      %13 = vector.shape_cast %12 : vector<16xf32> to vector<16x1xf32>
      %cst_11 = arith.constant 6.400000e+01 : f32
      %14 = vector.broadcast %cst_11 : f32 to vector<16x1xf32>
      %15 = arith.divf %13, %14 : vector<16x1xf32>
      %16 = vector.broadcast %15 : vector<16x1xf32> to vector<16x64xf32>
      %17 = arith.subf %11, %16 : vector<16x64xf32>
      %18 = arith.mulf %17, %17 : vector<16x64xf32>
      %cst_12 = arith.constant dense<0.000000e+00> : vector<16xf32>
      %19 = vector.multi_reduction <add>, %18, %cst_12 [1] : vector<16x64xf32> to vector<16xf32>
      %20 = vector.shape_cast %19 : vector<16xf32> to vector<16x1xf32>
      %cst_13 = arith.constant 6.400000e+01 : f32
      %21 = vector.broadcast %cst_13 : f32 to vector<16x1xf32>
      %22 = arith.divf %20, %21 : vector<16x1xf32>
      %23 = vector.broadcast %15 : vector<16x1xf32> to vector<16x64xf32>
      %24 = arith.subf %11, %23 : vector<16x64xf32>
      %cst_14 = arith.constant 9.99999974E-6 : f32
      %25 = vector.broadcast %cst_14 : f32 to vector<16x1xf32>
      %26 = arith.addf %22, %25 : vector<16x1xf32>
      %27 = math.rsqrt %26 : vector<16x1xf32>
      %28 = vector.broadcast %27 : vector<16x1xf32> to vector<16x64xf32>
      %29 = arith.mulf %24, %28 : vector<16x64xf32>
      %c0_15 = arith.constant 0 : index
      %c0_16 = arith.constant 0 : index
      %30 = vector.load %arg4[%c0_15, %c0_16] : memref<1x64xf32, #tpu.memory_space<vmem>>, vector<1x64xf32>
      %31 = vector.broadcast %30 : vector<1x64xf32> to vector<16x64xf32>
      %32 = arith.mulf %29, %31 : vector<16x64xf32>
      %c0_17 = arith.constant 0 : index
      %c0_18 = arith.constant 0 : index
      %33 = vector.load %arg5[%c0_17, %c0_18] : memref<1x64xf32, #tpu.memory_space<vmem>>, vector<1x64xf32>
      %34 = vector.broadcast %33 : vector<1x64xf32> to vector<16x64xf32>
      %35 = arith.addf %32, %34 : vector<16x64xf32>
      %36 = arith.truncf %35 : vector<16x64xf32> to vector<16x64xbf16>
      %c0_19 = arith.constant 0 : index
      %c0_20 = arith.constant 0 : index
      %37 = vector.load %arg9[%c0_19, %c0_20] : memref<16x64xbf16, #tpu.memory_space<vmem>>, vector<16x64xbf16>
      tpu.vector_store %arg9[%c0_19, %c0_20], %36 {strides = array<i32>} : memref<16x64xbf16, #tpu.memory_space<vmem>>, vector<16x64xbf16>,
    } else {
    }
    %c0 = arith.constant 0 : index
    %c0_1 = arith.constant 0 : index
    %3 = vector.load %arg6[%c0, %c0_1] : memref<64x32xbf16, #tpu.memory_space<vmem>>, vector<64x32xbf16>
    %c0_2 = arith.constant 0 : index
    %c0_3 = arith.constant 0 : index
    %4 = vector.load %arg9[%c0_2, %c0_3] : memref<16x64xbf16, #tpu.memory_space<vmem>>, vector<16x64xbf16>
    %cst = arith.constant dense<0.000000e+00> : vector<16x32xf32>
    %5 = tpu.matmul %4, %3, %cst {dimension_numbers = #tpu.dot_dimension_numbers<[1], [0], [0], [1], [0, 0, 1, 1], [], []>} : vector<16x64xbf16>, vector<64x32xbf16>, vector<16x32xf32> -> vector<16x32xf32>
    %c0_4 = arith.constant 0 : index
    %c0_5 = arith.constant 0 : index
    %6 = vector.load %arg7[%c0_4, %c0_5] : memref<1x32xf32, #tpu.memory_space<vmem>>, vector<1x32xf32>
    %7 = vector.broadcast %6 : vector<1x32xf32> to vector<16x32xf32>
    %8 = arith.addf %5, %7 : vector<16x32xf32>
    %c0_6 = arith.constant 0 : index
    %c0_7 = arith.constant 0 : index
    %9 = vector.load %arg8[%c0_6, %c0_7] : memref<16x32xf32, #tpu.memory_space<vmem>>, vector<16x32xf32>
    tpu.vector_store %arg8[%c0_6, %c0_7], %8 {strides = array<i32>} : memref<16x32xf32, #tpu.memory_space<vmem>>, vector<16x32xf32>,
    return
  }
  func.func @transform_0(%arg0: i32, %arg1: i32, %arg2: i32) -> (i32, i32) {
    %c0_i32 = arith.constant 0 : i32
    %c0_i32_0 = arith.constant 0 : i32
    return %arg0, %c0_i32 : i32, i32
  }
  func.func @transform_1(%arg0: i32, %arg1: i32, %arg2: i32) -> (i32, i32) {
    %c0_i32 = arith.constant 0 : i32
    %c0_i32_0 = arith.constant 0 : i32
    %c0_i32_1 = arith.constant 0 : i32
    return %c0_i32, %c0_i32_0 : i32, i32
  }
  func.func @transform_2(%arg0: i32, %arg1: i32, %arg2: i32) -> (i32, i32) {
    %c0_i32 = arith.constant 0 : i32
    %c0_i32_0 = arith.constant 0 : i32
    %c0_i32_1 = arith.constant 0 : i32
    return %c0_i32, %c0_i32_0 : i32, i32
  }
  func.func @transform_3(%arg0: i32, %arg1: i32, %arg2: i32) -> (i32, i32) {
    %c0_i32 = arith.constant 0 : i32
    %c0_i32_0 = arith.constant 0 : i32
    return %c0_i32, %arg1 : i32, i32
  }
  func.func @transform_4(%arg0: i32, %arg1: i32, %arg2: i32) -> (i32, i32) {
    %c0_i32 = arith.constant 0 : i32
    %c0_i32_0 = arith.constant 0 : i32
    return %c0_i32, %arg1 : i32, i32
  }
  func.func @transform_5(%arg0: i32, %arg1: i32, %arg2: i32) -> (i32, i32) {
    %c0_i32 = arith.constant 0 : i32
    return %arg0, %arg1 : i32, i32
  }
}

module attributes {stable_mosaic.version = 11 : i64} {
  func.func @_ln_linear_kernel(%arg0: i32, %arg1: i32, %arg2: i32, %arg3: memref<16x32xf32, #tpu.memory_space<vmem>>, %arg4: memref<1x32xf32, #tpu.memory_space<vmem>>, %arg5: memref<1x32xf32, #tpu.memory_space<vmem>>, %arg6: memref<32x64xbf16, #tpu.memory_space<vmem>>, %arg7: memref<1x64xf32, #tpu.memory_space<vmem>>, %arg8: memref<16x64xbf16, #tpu.memory_space<vmem>>, %arg9: memref<16x32xbf16, #tpu.memory_space<vmem>>) attributes {dimension_semantics = [#tpu.dimension_semantics<parallel>, #tpu.dimension_semantics<arbitrary>, #tpu.dimension_semantics<arbitrary>], iteration_bounds = array<i64: 1, 1, 1>, scalar_prefetch = 0 : i64, scratch_operands = 1 : i64, tpu.core_type = #tpu.core_type<tc>, window_params = [{transform_indices = @transform_0, window_bounds = array<i64: 16, 32>}, {pipeline_mode = #tpu.pipeline_mode<synchronous>, transform_indices = @transform_1, window_bounds = array<i64: 1, 32>}, {pipeline_mode = #tpu.pipeline_mode<synchronous>, transform_indices = @transform_2, window_bounds = array<i64: 1, 32>}, {transform_indices = @transform_3, window_bounds = array<i64: 32, 64>}, {transform_indices = @transform_4, window_bounds = array<i64: 1, 64>}, {transform_indices = @transform_5, window_bounds = array<i64: 16, 64>}]} {
    %c0_i32 = arith.constant 0 : i32
    %0 = arith.cmpi eq, %arg1, %c0_i32 : i32
    %1 = arith.extui %0 : i1 to i32
    %c0_i32_0 = arith.constant 0 : i32
    %2 = arith.cmpi ne, %1, %c0_i32_0 : i32
    scf.if %2 {
      %c0_9 = arith.constant 0 : index
      %c0_10 = arith.constant 0 : index
      %13 = vector.load %arg3[%c0_9, %c0_10] : memref<16x32xf32, #tpu.memory_space<vmem>>, vector<16x32xf32>
      %cst_11 = arith.constant dense<0.000000e+00> : vector<16xf32>
      %14 = vector.multi_reduction <add>, %13, %cst_11 [1] : vector<16x32xf32> to vector<16xf32>
      %15 = vector.shape_cast %14 : vector<16xf32> to vector<16x1xf32>
      %cst_12 = arith.constant 3.200000e+01 : f32
      %16 = vector.broadcast %cst_12 : f32 to vector<16x1xf32>
      %17 = arith.divf %15, %16 : vector<16x1xf32>
      %18 = vector.broadcast %17 : vector<16x1xf32> to vector<16x32xf32>
      %19 = arith.subf %13, %18 : vector<16x32xf32>
      %20 = arith.mulf %19, %19 : vector<16x32xf32>
      %cst_13 = arith.constant dense<0.000000e+00> : vector<16xf32>
      %21 = vector.multi_reduction <add>, %20, %cst_13 [1] : vector<16x32xf32> to vector<16xf32>
      %22 = vector.shape_cast %21 : vector<16xf32> to vector<16x1xf32>
      %cst_14 = arith.constant 3.200000e+01 : f32
      %23 = vector.broadcast %cst_14 : f32 to vector<16x1xf32>
      %24 = arith.divf %22, %23 : vector<16x1xf32>
      %25 = vector.broadcast %17 : vector<16x1xf32> to vector<16x32xf32>
      %26 = arith.subf %13, %25 : vector<16x32xf32>
      %cst_15 = arith.constant 9.99999974E-6 : f32
      %27 = vector.broadcast %cst_15 : f32 to vector<16x1xf32>
      %28 = arith.addf %24, %27 : vector<16x1xf32>
      %29 = math.rsqrt %28 : vector<16x1xf32>
      %30 = vector.broadcast %29 : vector<16x1xf32> to vector<16x32xf32>
      %31 = arith.mulf %26, %30 : vector<16x32xf32>
      %c0_16 = arith.constant 0 : index
      %c0_17 = arith.constant 0 : index
      %32 = vector.load %arg4[%c0_16, %c0_17] : memref<1x32xf32, #tpu.memory_space<vmem>>, vector<1x32xf32>
      %33 = vector.broadcast %32 : vector<1x32xf32> to vector<16x32xf32>
      %34 = arith.mulf %31, %33 : vector<16x32xf32>
      %c0_18 = arith.constant 0 : index
      %c0_19 = arith.constant 0 : index
      %35 = vector.load %arg5[%c0_18, %c0_19] : memref<1x32xf32, #tpu.memory_space<vmem>>, vector<1x32xf32>
      %36 = vector.broadcast %35 : vector<1x32xf32> to vector<16x32xf32>
      %37 = arith.addf %34, %36 : vector<16x32xf32>
      %38 = arith.truncf %37 : vector<16x32xf32> to vector<16x32xbf16>
      %c0_20 = arith.constant 0 : index
      %c0_21 = arith.constant 0 : index
      %39 = vector.load %arg9[%c0_20, %c0_21] : memref<16x32xbf16, #tpu.memory_space<vmem>>, vector<16x32xbf16>
      tpu.vector_store %arg9[%c0_20, %c0_21], %38 {strides = array<i32>} : memref<16x32xbf16, #tpu.memory_space<vmem>>, vector<16x32xbf16>,
    } else {
    }
    %c0 = arith.constant 0 : index
    %c0_1 = arith.constant 0 : index
    %3 = vector.load %arg6[%c0, %c0_1] : memref<32x64xbf16, #tpu.memory_space<vmem>>, vector<32x64xbf16>
    %c0_2 = arith.constant 0 : index
    %c0_3 = arith.constant 0 : index
    %4 = vector.load %arg9[%c0_2, %c0_3] : memref<16x32xbf16, #tpu.memory_space<vmem>>, vector<16x32xbf16>
    %cst = arith.constant dense<0.000000e+00> : vector<16x64xf32>
    %5 = tpu.matmul %4, %3, %cst {dimension_numbers = #tpu.dot_dimension_numbers<[1], [0], [0], [1], [0, 0, 1, 1], [], []>} : vector<16x32xbf16>, vector<32x64xbf16>, vector<16x64xf32> -> vector<16x64xf32>
    %c0_4 = arith.constant 0 : index
    %c0_5 = arith.constant 0 : index
    %6 = vector.load %arg7[%c0_4, %c0_5] : memref<1x64xf32, #tpu.memory_space<vmem>>, vector<1x64xf32>
    %7 = vector.broadcast %6 : vector<1x64xf32> to vector<16x64xf32>
    %8 = arith.addf %5, %7 : vector<16x64xf32>
    %cst_6 = arith.constant 0.000000e+00 : f32
    %9 = vector.broadcast %cst_6 : f32 to vector<16x64xf32>
    %10 = arith.maximumf %8, %9 : vector<16x64xf32>
    %11 = arith.truncf %10 : vector<16x64xf32> to vector<16x64xbf16>
    %c0_7 = arith.constant 0 : index
    %c0_8 = arith.constant 0 : index
    %12 = vector.load %arg8[%c0_7, %c0_8] : memref<16x64xbf16, #tpu.memory_space<vmem>>, vector<16x64xbf16>
    tpu.vector_store %arg8[%c0_7, %c0_8], %11 {strides = array<i32>} : memref<16x64xbf16, #tpu.memory_space<vmem>>, vector<16x64xbf16>,
    return
  }
  func.func @transform_0(%arg0: i32, %arg1: i32, %arg2: i32) -> (i32, i32) {
    %c0_i32 = arith.constant 0 : i32
    %c0_i32_0 = arith.constant 0 : i32
    return %arg0, %c0_i32 : i32, i32
  }
  func.func @transform_1(%arg0: i32, %arg1: i32, %arg2: i32) -> (i32, i32) {
    %c0_i32 = arith.constant 0 : i32
    %c0_i32_0 = arith.constant 0 : i32
    %c0_i32_1 = arith.constant 0 : i32
    return %c0_i32, %c0_i32_0 : i32, i32
  }
  func.func @transform_2(%arg0: i32, %arg1: i32, %arg2: i32) -> (i32, i32) {
    %c0_i32 = arith.constant 0 : i32
    %c0_i32_0 = arith.constant 0 : i32
    %c0_i32_1 = arith.constant 0 : i32
    return %c0_i32, %c0_i32_0 : i32, i32
  }
  func.func @transform_3(%arg0: i32, %arg1: i32, %arg2: i32) -> (i32, i32) {
    %c0_i32 = arith.constant 0 : i32
    %c0_i32_0 = arith.constant 0 : i32
    return %c0_i32, %arg1 : i32, i32
  }
  func.func @transform_4(%arg0: i32, %arg1: i32, %arg2: i32) -> (i32, i32) {
    %c0_i32 = arith.constant 0 : i32
    %c0_i32_0 = arith.constant 0 : i32
    return %c0_i32, %arg1 : i32, i32
  }
  func.func @transform_5(%arg0: i32, %arg1: i32, %arg2: i32) -> (i32, i32) {
    %c0_i32 = arith.constant 0 : i32
    return %arg0, %arg1 : i32, i32
  }
}

</mosaic_0001>

<bundles_post_ra>
// kernel: dilated_transformer_decoder_layer.13
= control target key start
LH: loop header
LB: loop body
LE: loop exit
PB: predicated region body
PF: predicated region fallthrough
CT: control target
= control target key end

     0   :  { %s623_s12 = smov 0   ;;  %s660_s0 = inlined_call_operand.vmem [shape: bf16[4,4,8], index: 0, kind: input, shape index: {}]   ;;  %s661_s1 = inlined_call_operand.vmem [shape: bf16[4,4,8], index: 1, kind: input, shape index: {}]   ;;  %s662_s2 = inlined_call_operand.vmem [shape: bf16[4,4,8], index: 2, kind: input, shape index: {}]   ;;  %s663_s3 = inlined_call_operand.vmem [shape: bf16[4,4,8], index: 3, kind: output, shape index: {}]  }
   0x1 LB: > { %s524_s13 = sadd.s32 4294967295, %s599_s12   ;;  %p528_p0 = scmp.ge.s32.totalorder %s599_s12, 1  ;;  %s599_s12 = sphi %s623_s12, %s13_s12  }
   0x2   : > { %p160_p1 = scmp.lt.s32.totalorder %s599_s12, 3 }
   0x4   : > { %p161_p2 = pnand %p528_p0, %p160_p1 }
   0x5   : > { %s529_s14 = sshll.u32 (!%p161_p2), %s524_s13, 1 }
   0x6   : > { %164 = sbr.rel (%p161_p2) target bundleno = 580 (0x244), region = 32  ;;  %p195_p3 = scmp.lt.s32.totalorder (!%p161_p2), %s529_s14, 3 }
   0xb   : > { %v601_v0 = vmov 0.0   ;;  %vm602_vm0 = vmmov 0   ;;  %s665_s14 = smov (!%p195_p3, %s529_s14), 3  ;;  %vm225_vm1 = vcmask 64512   ;;  %vm320_vm2 = vcmask 27648  }
   0xc   : > { %551 = vmatprep.subr.bf16.mxu0 %v601_v0  ;;  %557 = vmatprep.subr.bf16.mxu1 %v601_v0  ;;  %s633_s15 = sshll.u32 %s665_s14, 1  ;;  %vm345_vm3 = vcmask 1041408   ;;  %vm341_vm4 = vcmask 31744   ;;  %vm441_vm5 = vcmask 58368  }
   0xd   : > { %553 = vmatprep.mubr.msk.bf16.mxu0 %vm602_vm0, %v601_v0  ;;  %559 = vmatprep.mubr.msk.bf16.mxu1 %vm602_vm0, %v601_v0  ;;  %s204_s18 = scalar_lea.vmem %s661_s1, %s633_s15  ;;  %s198_s21 = scalar_lea.vmem %s660_s0, %s633_s15 }
   0xe   : > { %v221_v1 = vld [vmem:[%s204_s18] sm:$0x3]  ;;  %v222_v2 = vld [vmem:[%s204_s18 + $0x2] sm:$0x3]  ;;  %s210_s24 = scalar_lea.vmem %s662_s2, %s633_s15  ;;  %s216_s27 = scalar_lea.vmem %s663_s3, %s633_s15 }
   0xf   : > { %v230_v3 = vsel %vm225_vm1, %v221_v1, 0  ;;  %v276_v4 = vsel %vm225_vm1, %v222_v2, 0  ;;  %v219_v5 = vld [vmem:[%s198_s21] sm:$0x3]  ;;  %v220_v6 = vld [vmem:[%s198_s21 + $0x2] sm:$0x3] }
  0x10   : > { %552 = vmatpush3.bf16.xpose.msra.mxu0 %v230_v3  ;;  %558 = vmatpush3.bf16.xpose.msra.mxu1 %v276_v4  ;;  %v223_v19 = vld [vmem:[%s210_s24] sm:$0x3]  ;;  %v224_v20 = vld [vmem:[%s210_s24 + $0x2] sm:$0x3] }
  0x11   : > { %563 = vmatprep.subr.bf16.mxu0 %v601_v0  ;;  %569 = vmatprep.subr.bf16.mxu1 %v601_v0  ;;  %v347_v21 = vsel %vm345_vm3, %v223_v19, 0  ;;  %v393_v22 = vsel %vm345_vm3, %v224_v20, 0 }
  0x17   : > { %554 = vmatmul.mubr.msk.bf16.vlgmr.msra.gmra.mxu0 %vm225_vm1, %v219_v5  ;;  %560 = vmatmul.mubr.msk.bf16.vlgmr.msra.gmra.mxu1 %vm225_vm1, %v220_v6 }
  0x18   : > { %565 = vmatprep.mubr.msk.bf16.mxu0 %vm602_vm0, %v601_v0  ;;  %571 = vmatprep.mubr.msk.bf16.mxu1 %vm602_vm0, %v601_v0 }
  0x19   : > { %564 = vmatpush3.bf16.msra.mxu0 %v347_v21  ;;  %570 = vmatpush3.bf16.msra.mxu1 %v393_v22 }
  0xd7   : > { %v266_v7 = vpop.f32.mrf.mxu0  ;;  %v312_v8 = vpop.f32.mrf.mxu1 }
  0xd8   : > { %v318_v9 = vmul.f32 0.35355338, %v266_v7  ;;  %v319_v10 = vmul.f32 0.35355338, %v312_v8 }
  0xd9   : > { %v555_v11 = vpop.f32.mrf.mxu0  ;;  %v561_v12 = vpop.f32.mrf.mxu1 }
  0xda   : > { %v321_v13 = vsel %vm320_vm2, %v318_v9, -inf  ;;  %v324_v16 = vsel %vm320_vm2, %v319_v10, -inf }
  0xdb   : > { %v315_v14 = vpop.f32.mrf.mxu1  ;;  %322 = vmax.xlane.f32.xlu0 %v321_v13  ;;  %v269_v15 = vpop.f32.mrf.mxu0 }
  0xdd   : > { %v556_v17 = vpop.f32.mrf.mxu0  ;;  %v562_v18 = vpop.f32.mrf.mxu1 }
  0xdf   : > { %325 = vmax.xlane.f32.xlu0 %v324_v16 }
 0x164   : > { %v323_v23 = vpop.xlane.xlu0 %322 }
 0x165   : > { %v327_v24 = vsub.f32 %v318_v9, %v323_v23 }
 0x167   : > { %v329_v25 = vmul.f32 1.442695, %v327_v24 }
 0x168   : > { %v326_v26 = vpop.xlane.xlu0 %325 }
 0x169   : > { %585 = vpow2.f32 %v329_v25  ;;  %v328_v27 = vsub.f32 %v319_v10, %v326_v26 }
 0x16b   : > { %v331_v28 = vmul.f32 1.442695, %v328_v27 }
 0x16d   : > { %587 = vpow2.f32 %v331_v28 }
 0x176   : > { %v586_v29 = vpop.eup %585 }
 0x177   : > { %v333_v30 = vsel %vm320_vm2, %v586_v29, 0.0  ;;  %v339_v31 = vpack.c.bf16 %v586_v29, %v586_v29 }
 0x178   : > { %334 = vadd.xlane.f32.xlu1 %v333_v30 }
 0x179   : > { %566 = vmatmul.mubr.msk.bf16.vlgmr.msra.gmra.mxu0 %vm341_vm4, %v339_v31 }
 0x17a   : > { %v588_v32 = vpop.eup %587 }
 0x17b   : > { %v336_v33 = vsel %vm320_vm2, %v588_v32, 0.0  ;;  %v340_v34 = vpack.c.bf16 %v588_v32, %v588_v32 }
 0x17c   : > { %337 = vadd.xlane.f32.xlu1 %v336_v33 }
 0x17d   : > { %572 = vmatmul.mubr.msk.bf16.vlgmr.msra.gmra.mxu1 %vm341_vm4, %v340_v34 }
 0x201   : > { %v335_v35 = vpop.xlane.xlu1 %334 }
 0x202   : > { %589 = vrcp.f32 %v335_v35 }
 0x205   : > { %v338_v36 = vpop.xlane.xlu1 %337 }
 0x206   : > { %591 = vrcp.f32 %v338_v36 }
 0x20f   : > { %v590_v37 = vpop.eup %589 }
 0x213   : > { %v592_v42 = vpop.eup %591 }
 0x239   : > { %v383_v38 = vpop.f32.mrf.mxu0 }
 0x23a   : > { %v437_v39 = vmul.f32 %v590_v37, %v383_v38 }
 0x23b   : > { %v567_v40 = vpop.f32.mrf.mxu0 }
 0x23c   : > { %v439_v41 = vpack.c.bf16 %v437_v39, %v437_v39 }
 0x23d   : > { %v386_v43 = vpop.f32.mrf.mxu0  ;;  %v429_v44 = vpop.f32.mrf.mxu1 }
 0x23e   : > { %442 = vst.msk [vmem:[%s216_s27] sm:$0x3] %vm441_vm5, %v439_v41  ;;  %v438_v45 = vmul.f32 %v592_v42, %v429_v44 }
 0x23f   : > { %v568_v46 = vpop.f32.mrf.mxu0  ;;  %v573_v47 = vpop.f32.mrf.mxu1 }
 0x240   : > { %v440_v48 = vpack.c.bf16 %v438_v45, %v438_v45 }
 0x241   : > { %v432_v49 = vpop.f32.mrf.mxu1 }
 0x242   : > { %443 = vst.msk [vmem:[%s216_s27 + $0x2] sm:$0x3] %vm441_vm5, %v440_v48 }
 0x243   : > { %v574_v50 = vpop.f32.mrf.mxu1 }
 0x244 PF: > { %s13_s12 = sadd.s32 1, %s599_s12  }
 0x245   : > { %p10_p4 = scmp.ge.s32.totalorder %s13_s12, 4  }
 0x247   :  { %12 = sbr.rel (!%p10_p4) target bundleno = 1 (0x1), region = 68 }

// kernel: dilated_transformer_decoder_layer.11
= control target key start
LH: loop header
LB: loop body
LE: loop exit
PB: predicated region body
PF: predicated region fallthrough
CT: control target
= control target key end

     0   :  { %vm27_vm0 = vcmask 261120   ;;  %v209_v15 = vmov 0.0   ;;  %vm210_vm1 = vmmov 0   ;;  %vm81_vm2 = vcmask 257024   ;;  %s273_s0 = inlined_call_operand.vmem [shape: f32[16,32], index: 0, kind: input, shape index: {}]   ;;  %s274_s3 = inlined_call_operand.vmem [shape: bf16[32,96], index: 3, kind: input, shape index: {}]   ;;  %s275_s1 = inlined_call_operand.vmem [shape: f32[1,32], index: 1, kind: input, shape index: {}]   ;;  %s276_s2 = inlined_call_operand.vmem [shape: f32[1,32], index: 2, kind: input, shape index: {}]   ;;  %s277_s4 = inlined_call_operand.vmem [shape: f32[1,96], index: 4, kind: input, shape index: {}]   ;;  %s278_s5 = inlined_call_operand.vmem [shape: bf16[16,96], index: 5, kind: output, shape index: {}]  }
   0x1   :  { %v25_v0 = vld [vmem:[%s273_s0] sm:$0xff]  ;;  %v26_v1 = vld [vmem:[%s273_s0 + $0x8] sm:$0xff]  ;;  %192 = vmatprep.subr.bf16.mxu0 %v209_v15  ;;  %196 = vmatprep.mubr.msk.bf16.mxu0 %vm210_vm1, %v209_v15  ;;  %vm167_vm3 = vcmask 781312  }
   0x2   :  { %v28_v2 = vsel %vm27_vm0, %v25_v0, 0.0  ;;  %v31_v3 = vsel %vm27_vm0, %v26_v1, 0.0  ;;  %v202_v14 = vld [vmem:[%s274_s3 + $0x8] sm:$0xff]   ;;  %v203_v16 = vld [vmem:[%s274_s3] sm:$0xff]  }
   0x3   :  { %29 = vadd.xlane.f32.xlu0 %v28_v2  ;;  %193 = vmatpush3.bf16.msra.mxu0 %v202_v14  ;;  %v174_v24 = vld [vmem:[%s275_s1] ss:$0 sm:$0xff] }
   0x4   :  { %194 = vmatprep.subr.bf16.mxu0 %v209_v15  ;;  %v175_v26 = vld [vmem:[%s276_s2] ss:$0 sm:$0xff] }
   0x5   :  { %v178_v36 = vld [vmem:[%s277_s4] ss:$0 sm:$0xff] }
   0x7   :  { %32 = vadd.xlane.f32.xlu0 %v31_v3  ;;  %195 = vmatpush3.bf16.msra.mxu0 %v203_v16 }
  0x8c   :  { %v30_v4 = vpop.xlane.xlu0 %29 }
  0x8d   :  { %v35_v5 = vmul.f32 0.03125, %v30_v4 }
  0x8f   :  { %v37_v6 = vsub.f32 %v25_v0, %v35_v5 }
  0x90   :  { %v33_v7 = vpop.xlane.xlu0 %32 }
  0x91   :  { %v36_v8 = vmul.f32 0.03125, %v33_v7  ;;  %v39_v9 = vmul.f32 %v37_v6, %v37_v6 }
  0x93   :  { %v38_v10 = vsub.f32 %v26_v1, %v36_v8  ;;  %v41_v11 = vsel %vm27_vm0, %v39_v9, 0.0 }
  0x94   :  { %42 = vadd.xlane.f32.xlu1 %v41_v11 }
  0x95   :  { %v40_v12 = vmul.f32 %v38_v10, %v38_v10 }
  0x97   :  { %v44_v13 = vsel %vm27_vm0, %v40_v12, 0.0 }
  0x98   :  { %45 = vadd.xlane.f32.xlu1 %v44_v13 }
 0x11d   :  { %v43_v17 = vpop.xlane.xlu1 %42 }
 0x11e   :  { %v47_v18 = vmul.f32 0.03125, %v43_v17 }
 0x120   :  { %v49_v19 = vadd.f32 1e-05, %v47_v18 }
 0x121   :  { %v46_v20 = vpop.xlane.xlu1 %45 }
 0x122   :  { %205 = vrsqrt.f32 %v49_v19  ;;  %v48_v21 = vmul.f32 0.03125, %v46_v20 }
 0x124   :  { %v50_v22 = vadd.f32 1e-05, %v48_v21 }
 0x126   :  { %207 = vrsqrt.f32 %v50_v22 }
 0x12f   :  { %v206_v23 = vpop.eup %205 }
 0x130   :  { %v53_v25 = vmul.f32 %v206_v23, %v37_v6 }
 0x132   :  { %v62_v27 = vmul.f32 %v174_v24, %v53_v25 }
 0x133   :  { %v208_v28 = vpop.eup %207 }
 0x134   :  { %v71_v29 = vadd.f32 %v175_v26, %v62_v27  ;;  %v54_v30 = vmul.f32 %v208_v28, %v38_v10 }
 0x136   :  { %v185_v31 = vpack.c.bf16 %v71_v29, %v71_v29  ;;  %v63_v32 = vmul.f32 %v174_v24, %v54_v30 }
 0x138   :  { %82 = vst.msk [vmem:[#allocation2] sm:$0xf] %vm81_vm2, %v185_v31  ;;  %v72_v33 = vadd.f32 %v175_v26, %v63_v32 }
 0x13a   :  { %v186_v34 = vpack.c.bf16 %v72_v33, %v72_v33 }
 0x13c   :  { %83 = vst.msk [vmem:[#allocation2 + $0x4] sm:$0xf] %vm81_vm2, %v186_v34 }
 0x143   :  { %v204_v35 = vld [vmem:[#allocation2] sm:$0xff]  }
 0x144   :  { %197 = vmatmul.mubr.msk.bf16.vlgmr.msra.gmra.mxu0 %vm27_vm0, %v204_v35 }
 0x204   :  { %v152_v37 = vpop.f32.mrf.mxu0 }
 0x205   :  { %v153_v38 = vadd.f32 %v178_v36, %v152_v37 }
 0x206   :  { %v198_v39 = vpop.f32.mrf.mxu0 }
 0x207   :  { %v187_v40 = vpack.c.bf16 %v153_v38, %v153_v38 }
 0x208   :  { %v155_v41 = vpop.f32.mrf.mxu0 }
 0x209   :  { %168 = vst.msk [vmem:[%s278_s5] sm:$0xf] %vm167_vm3, %v187_v40  ;;  %v156_v42 = vadd.f32 %v178_v36, %v155_v41 }
 0x20a   :  { %v199_v43 = vpop.f32.mrf.mxu0 }
 0x20b   :  { %v188_v44 = vpack.c.bf16 %v156_v42, %v156_v42 }
 0x20d   :  { %169 = vst.msk [vmem:[%s278_s5 + $0x4] sm:$0xf] %vm167_vm3, %v188_v44 }

// kernel: dilated_transformer_decoder_layer.12
= control target key start
LH: loop header
LB: loop body
LE: loop exit
PB: predicated region body
PF: predicated region fallthrough
CT: control target
= control target key end

     0   :  { %s887_s12 = smov 0   ;;  %s964_s0 = inlined_call_operand.vmem [shape: bf16[8,4,8], index: 0, kind: input, shape index: {}]   ;;  %s965_s1 = inlined_call_operand.vmem [shape: bf16[8,4,8], index: 1, kind: input, shape index: {}]   ;;  %s966_s2 = inlined_call_operand.vmem [shape: bf16[8,4,8], index: 2, kind: input, shape index: {}]   ;;  %s967_s3 = inlined_call_operand.vmem [shape: bf16[8,4,8], index: 3, kind: output, shape index: {}]  }
   0x1 LB: > { %s744_s13 = sadd.s32 4294967295, %s863_s12   ;;  %p748_p0 = scmp.ge.s32.totalorder %s863_s12, 1  ;;  %s863_s12 = sphi %s887_s12, %s13_s12  }
   0x2   : > { %p160_p1 = scmp.lt.s32.totalorder %s863_s12, 3 }
   0x4   : > { %p161_p2 = pnand %p748_p0, %p160_p1 }
   0x5   : > { %s749_s14 = sshll.u32 (!%p161_p2), %s744_s13, 2 }
   0x6   : > { %164 = sbr.rel (%p161_p2) target bundleno = 588 (0x24c), region = 32  ;;  %p195_p3 = scmp.lt.s32.totalorder (!%p161_p2), %s749_s14, 7 }
   0xb   : > { %v865_v0 = vmov 0.0   ;;  %vm866_vm0 = vmmov 0   ;;  %s969_s14 = smov (!%p195_p3, %s749_s14), 7  ;;  %vm231_vm1 = vcmask 64512   ;;  %vm420_vm2 = vcmask 27648  }
   0xc   : > { %783 = vmatprep.subr.bf16.mxu0 %v865_v0  ;;  %789 = vmatprep.subr.bf16.mxu1 %v865_v0  ;;  %s901_s15 = sshll.u32 %s969_s14, 1  ;;  %vm465_vm3 = vcmask 1041408   ;;  %vm461_vm4 = vcmask 31744   ;;  %vm659_vm5 = vcmask 58368  }
   0xd   : > { %785 = vmatprep.mubr.msk.bf16.mxu0 %vm866_vm0, %v865_v0  ;;  %791 = vmatprep.mubr.msk.bf16.mxu1 %vm866_vm0, %v865_v0  ;;  %s204_s18 = scalar_lea.vmem %s965_s1, %s901_s15  ;;  %s198_s21 = scalar_lea.vmem %s964_s0, %s901_s15 }
   0xe   : > { %v223_v1 = vld [vmem:[%s204_s18] sm:$0x3]  ;;  %v224_v2 = vld [vmem:[%s204_s18 + $0x2] sm:$0x3]  ;;  %v225_v5 = vld [vmem:[%s204_s18 + $0x4] sm:$0x3]  ;;  %s210_s24 = scalar_lea.vmem %s966_s2, %s901_s15  ;;  %s216_s27 = scalar_lea.vmem %s967_s3, %s901_s15 }
   0xf   : > { %v236_v3 = vsel %vm231_vm1, %v223_v1, 0  ;;  %v282_v4 = vsel %vm231_vm1, %v224_v2, 0  ;;  %v226_v6 = vld [vmem:[%s204_s18 + $0x6] sm:$0x3]  ;;  %v219_v7 = vld [vmem:[%s198_s21] sm:$0x3] }
  0x10   : > { %784 = vmatpush3.bf16.xpose.msra.mxu0 %v236_v3  ;;  %790 = vmatpush3.bf16.xpose.msra.mxu1 %v282_v4  ;;  %v220_v8 = vld [vmem:[%s198_s21 + $0x2] sm:$0x3]  ;;  %v328_v9 = vsel %vm231_vm1, %v225_v5, 0  ;;  %v374_v10 = vsel %vm231_vm1, %v226_v6, 0  ;;  %v221_v11 = vld [vmem:[%s198_s21 + $0x4] sm:$0x3] }
  0x11   : > { %795 = vmatprep.subr.bf16.mxu0 %v865_v0  ;;  %801 = vmatprep.subr.bf16.mxu1 %v865_v0  ;;  %v222_v12 = vld [vmem:[%s198_s21 + $0x6] sm:$0x3]  ;;  %v227_v37 = vld [vmem:[%s210_s24] sm:$0x3]  ;;  %v228_v39 = vld [vmem:[%s210_s24 + $0x2] sm:$0x3] }
  0x12   : > { %v467_v38 = vsel %vm465_vm3, %v227_v37, 0  ;;  %v513_v40 = vsel %vm465_vm3, %v228_v39, 0  ;;  %v229_v41 = vld [vmem:[%s210_s24 + $0x4] sm:$0x3]  ;;  %v230_v43 = vld [vmem:[%s210_s24 + $0x6] sm:$0x3] }
  0x13   : > { %v559_v42 = vsel %vm465_vm3, %v229_v41, 0  ;;  %v605_v44 = vsel %vm465_vm3, %v230_v43, 0 }
  0x17   : > { %786 = vmatmul.mubr.msk.bf16.vlgmr.msra.gmra.mxu0 %vm231_vm1, %v219_v7  ;;  %792 = vmatmul.mubr.msk.bf16.vlgmr.msra.gmra.mxu1 %vm231_vm1, %v220_v8 }
  0x18   : > { %796 = vmatpush3.bf16.xpose.msra.mxu0 %v328_v9  ;;  %802 = vmatpush3.bf16.xpose.msra.mxu1 %v374_v10 }
  0x19   : > { %797 = vmatprep.mubr.msk.bf16.mxu0 %vm866_vm0, %v865_v0  ;;  %803 = vmatprep.mubr.msk.bf16.mxu1 %vm866_vm0, %v865_v0 }
  0x1a   : > { %807 = vmatprep.subr.bf16.mxu0 %v865_v0  ;;  %813 = vmatprep.subr.bf16.mxu1 %v865_v0 }
  0x1f   : > { %798 = vmatmul.mubr.msk.bf16.vlgmr.msra.gmra.mxu0 %vm231_vm1, %v221_v11  ;;  %804 = vmatmul.mubr.msk.bf16.vlgmr.msra.gmra.mxu1 %vm231_vm1, %v222_v12 }
  0x20   : > { %809 = vmatprep.mubr.msk.bf16.mxu0 %vm866_vm0, %v865_v0  ;;  %815 = vmatprep.mubr.msk.bf16.mxu1 %vm866_vm0, %v865_v0 }
  0x21   : > { %808 = vmatpush3.bf16.msra.mxu0 %v467_v38  ;;  %814 = vmatpush3.bf16.msra.mxu1 %v513_v40 }
  0x22   : > { %819 = vmatprep.subr.bf16.mxu0 %v865_v0  ;;  %825 = vmatprep.subr.bf16.mxu1 %v865_v0 }
  0xd7   : > { %v272_v13 = vpop.f32.mrf.mxu0  ;;  %v318_v14 = vpop.f32.mrf.mxu1 }
  0xd8   : > { %v416_v15 = vmul.f32 0.35355338, %v272_v13  ;;  %v417_v16 = vmul.f32 0.35355338, %v318_v14 }
  0xd9   : > { %v787_v17 = vpop.f32.mrf.mxu0  ;;  %v793_v18 = vpop.f32.mrf.mxu1 }
  0xda   : > { %v421_v19 = vsel %vm420_vm2, %v416_v15, -inf  ;;  %v424_v22 = vsel %vm420_vm2, %v417_v16, -inf }
  0xdb   : > { %v321_v20 = vpop.f32.mrf.mxu1  ;;  %422 = vmax.xlane.f32.xlu0 %v421_v19  ;;  %v275_v21 = vpop.f32.mrf.mxu0 }
  0xdd   : > { %v788_v23 = vpop.f32.mrf.mxu0  ;;  %v794_v24 = vpop.f32.mrf.mxu1 }
  0xdf   : > { %v410_v25 = vpop.f32.mrf.mxu1  ;;  %425 = vmax.xlane.f32.xlu0 %v424_v22  ;;  %v364_v26 = vpop.f32.mrf.mxu0 }
  0xe0   : > { %v419_v27 = vmul.f32 0.35355338, %v410_v25  ;;  %v418_v28 = vmul.f32 0.35355338, %v364_v26 }
  0xe1   : > { %v799_v29 = vpop.f32.mrf.mxu0  ;;  %v805_v30 = vpop.f32.mrf.mxu1 }
  0xe2   : > { %v427_v31 = vsel %vm420_vm2, %v418_v28, -inf  ;;  %v430_v34 = vsel %vm420_vm2, %v419_v27, -inf }
  0xe3   : > { %v413_v32 = vpop.f32.mrf.mxu1  ;;  %428 = vmax.xlane.f32.xlu1 %v427_v31  ;;  %v367_v33 = vpop.f32.mrf.mxu0 }
  0xe5   : > { %v800_v35 = vpop.f32.mrf.mxu0  ;;  %v806_v36 = vpop.f32.mrf.mxu1 }
  0xe7   : > { %431 = vmax.xlane.f32.xlu1 %v430_v34 }
 0x164   : > { %v423_v45 = vpop.xlane.xlu0 %422 }
 0x165   : > { %v433_v46 = vsub.f32 %v416_v15, %v423_v45 }
 0x167   : > { %v437_v47 = vmul.f32 1.442695, %v433_v46 }
 0x168   : > { %v426_v48 = vpop.xlane.xlu0 %425 }
 0x169   : > { %841 = vpow2.f32 %v437_v47  ;;  %v434_v49 = vsub.f32 %v417_v16, %v426_v48 }
 0x16b   : > { %v439_v50 = vmul.f32 1.442695, %v434_v49 }
 0x16c   : > { %v429_v51 = vpop.xlane.xlu1 %428 }
 0x16d   : > { %843 = vpow2.f32 %v439_v50  ;;  %v435_v52 = vsub.f32 %v418_v28, %v429_v51 }
 0x16f   : > { %v441_v53 = vmul.f32 1.442695, %v435_v52 }
 0x170   : > { %v432_v54 = vpop.xlane.xlu1 %431 }
 0x171   : > { %845 = vpow2.f32 %v441_v53  ;;  %v436_v55 = vsub.f32 %v419_v27, %v432_v54 }
 0x173   : > { %v443_v56 = vmul.f32 1.442695, %v436_v55 }
 0x175   : > { %847 = vpow2.f32 %v443_v56 }
 0x176   : > { %v842_v57 = vpop.eup %841 }
 0x177   : > { %v445_v58 = vsel %vm420_vm2, %v842_v57, 0.0  ;;  %v457_v59 = vpack.c.bf16 %v842_v57, %v842_v57 }
 0x178   : > { %446 = vadd.xlane.f32.xlu0 %v445_v58 }
 0x179   : > { %810 = vmatmul.mubr.msk.bf16.vlgmr.msra.gmra.mxu0 %vm461_vm4, %v457_v59 }
 0x17a   : > { %v844_v60 = vpop.eup %843  ;;  %820 = vmatpush3.bf16.msra.mxu0 %v559_v42  ;;  %821 = vmatprep.mubr.msk.bf16.mxu0 %vm866_vm0, %v865_v0 }
 0x17b   : > { %v448_v61 = vsel %vm420_vm2, %v844_v60, 0.0  ;;  %v458_v62 = vpack.c.bf16 %v844_v60, %v844_v60 }
 0x17c   : > { %449 = vadd.xlane.f32.xlu1 %v448_v61 }
 0x17d   : > { %816 = vmatmul.mubr.msk.bf16.vlgmr.msra.gmra.mxu1 %vm461_vm4, %v458_v62 }
 0x17e   : > { %v846_v63 = vpop.eup %845  ;;  %826 = vmatpush3.bf16.msra.mxu1 %v605_v44  ;;  %827 = vmatprep.mubr.msk.bf16.mxu1 %vm866_vm0, %v865_v0 }
 0x17f   : > { %v451_v1 = vsel %vm420_vm2, %v846_v63, 0.0  ;;  %v459_v2 = vpack.c.bf16 %v846_v63, %v846_v63 }
 0x180   : > { %452 = vadd.xlane.f32.xlu0 %v451_v1 }
 0x181   : > { %822 = vmatmul.mubr.msk.bf16.vlgmr.msra.gmra.mxu0 %vm461_vm4, %v459_v2 }
 0x182   : > { %v848_v3 = vpop.eup %847 }
 0x183   : > { %v454_v4 = vsel %vm420_vm2, %v848_v3, 0.0  ;;  %v460_v5 = vpack.c.bf16 %v848_v3, %v848_v3 }
 0x184   : > { %455 = vadd.xlane.f32.xlu1 %v454_v4 }
 0x185   : > { %828 = vmatmul.mubr.msk.bf16.vlgmr.msra.gmra.mxu1 %vm461_vm4, %v460_v5 }
 0x201   : > { %v447_v6 = vpop.xlane.xlu0 %446 }
 0x202   : > { %849 = vrcp.f32 %v447_v6 }
 0x205   : > { %v450_v7 = vpop.xlane.xlu1 %449 }
 0x206   : > { %851 = vrcp.f32 %v450_v7 }
 0x209   : > { %v453_v8 = vpop.xlane.xlu0 %452 }
 0x20a   : > { %853 = vrcp.f32 %v453_v8 }
 0x20d   : > { %v456_v0 = vpop.xlane.xlu1 %455 }
 0x20e   : > { %855 = vrcp.f32 %v456_v0 }
 0x20f   : > { %v850_v9 = vpop.eup %849 }
 0x213   : > { %v852_v14 = vpop.eup %851 }
 0x217   : > { %v854_v21 = vpop.eup %853 }
 0x21b   : > { %v856_v28 = vpop.eup %855 }
 0x239   : > { %v503_v10 = vpop.f32.mrf.mxu0 }
 0x23a   : > { %v651_v11 = vmul.f32 %v850_v9, %v503_v10 }
 0x23b   : > { %v811_v12 = vpop.f32.mrf.mxu0 }
 0x23c   : > { %v655_v13 = vpack.c.bf16 %v651_v11, %v651_v11 }
 0x23d   : > { %v506_v15 = vpop.f32.mrf.mxu0  ;;  %v549_v16 = vpop.f32.mrf.mxu1 }
 0x23e   : > { %660 = vst.msk [vmem:[%s216_s27] sm:$0x3] %vm659_vm5, %v655_v13  ;;  %v652_v17 = vmul.f32 %v852_v14, %v549_v16 }
 0x23f   : > { %v812_v18 = vpop.f32.mrf.mxu0  ;;  %v817_v19 = vpop.f32.mrf.mxu1 }
 0x240   : > { %v656_v20 = vpack.c.bf16 %v652_v17, %v652_v17 }
 0x241   : > { %v552_v22 = vpop.f32.mrf.mxu1  ;;  %v595_v23 = vpop.f32.mrf.mxu0 }
 0x242   : > { %661 = vst.msk [vmem:[%s216_s27 + $0x2] sm:$0x3] %vm659_vm5, %v656_v20  ;;  %v653_v24 = vmul.f32 %v854_v21, %v595_v23 }
 0x243   : > { %v818_v25 = vpop.f32.mrf.mxu1  ;;  %v823_v26 = vpop.f32.mrf.mxu0 }
 0x244   : > { %v657_v27 = vpack.c.bf16 %v653_v24, %v653_v24 }
 0x245   : > { %v598_v29 = vpop.f32.mrf.mxu0  ;;  %v641_v30 = vpop.f32.mrf.mxu1 }
 0x246   : > { %662 = vst.msk [vmem:[%s216_s27 + $0x4] sm:$0x3] %vm659_vm5, %v657_v27  ;;  %v654_v31 = vmul.f32 %v856_v28, %v641_v30 }
 0x247   : > { %v824_v32 = vpop.f32.mrf.mxu0  ;;  %v829_v33 = vpop.f32.mrf.mxu1 }
 0x248   : > { %v658_v34 = vpack.c.bf16 %v654_v31, %v654_v31 }
 0x249   : > { %v644_v35 = vpop.f32.mrf.mxu1 }
 0x24a   : > { %663 = vst.msk [vmem:[%s216_s27 + $0x6] sm:$0x3] %vm659_vm5, %v658_v34 }
 0x24b   : > { %v830_v36 = vpop.f32.mrf.mxu1 }
 0x24c PF: > { %s13_s12 = sadd.s32 1, %s863_s12  }
 0x24d   : > { %p10_p4 = scmp.ge.s32.totalorder %s13_s12, 4  }
 0x24f   :  { %12 = sbr.rel (!%p10_p4) target bundleno = 1 (0x1), region = 68 }

// kernel: dilated_transformer_decoder_layer.14
= control target key start
LH: loop header
LB: loop body
LE: loop exit
PB: predicated region body
PF: predicated region fallthrough
CT: control target
= control target key end

     0   :  { %v111_v0 = vmov 0.0   ;;  %vm112_vm0 = vmmov 0   ;;  %vm41_vm1 = vcmask 261120   ;;  %s154_s1 = inlined_call_operand.vmem [shape: bf16[32,32], index: 1, kind: input, shape index: {}]   ;;  %s155_s0 = inlined_call_operand.vmem [shape: f32[16,32], index: 0, kind: input, shape index: {}]   ;;  %s156_s2 = inlined_call_operand.vmem [shape: f32[1,32], index: 2, kind: input, shape index: {}]   ;;  %s157_s3 = inlined_call_operand.vmem [shape: f32[16,32], index: 3, kind: output, shape index: {}]  }
   0x1   :  { %99 = vmatprep.subr.bf16.mxu0 %v111_v0  ;;  %v109_v1 = vld [vmem:[%s154_s1 + $0x8] sm:$0xff]   ;;  %103 = vmatprep.mubr.msk.bf16.mxu0 %vm112_vm0, %v111_v0  ;;  %v110_v2 = vld [vmem:[%s154_s1] sm:$0xff]  }
   0x2   :  { %100 = vmatpush3.bf16.msra.mxu0 %v109_v1  ;;  %v15_v3 = vld [vmem:[%s155_s0] sm:$0xff]  ;;  %v16_v4 = vld [vmem:[%s155_s0 + $0x8] sm:$0xff] }
   0x3   :  { %101 = vmatprep.subr.bf16.mxu0 %v111_v0  ;;  %v17_v5 = vpack.c.bf16 %v16_v4, %v15_v3  ;;  %v92_v6 = vld [vmem:[%s156_s2] ss:$0 sm:$0xff] }
   0x6   :  { %102 = vmatpush3.bf16.msra.mxu0 %v110_v2 }
   0x9   :  { %104 = vmatmul.mubr.msk.bf16.vlgmr.msra.gmra.mxu0 %vm41_vm1, %v17_v5 }
  0xc9   :  { %v79_v7 = vpop.f32.mrf.mxu0 }
  0xca   :  { %v80_v8 = vadd.f32 %v92_v6, %v79_v7 }
  0xcb   :  { %v105_v9 = vpop.f32.mrf.mxu0 }
  0xcc   :  { %86 = vst.msk [vmem:[%s157_s3] sm:$0xff] %vm41_vm1, %v80_v8 }
  0xcd   :  { %v82_v10 = vpop.f32.mrf.mxu0 }
  0xce   :  { %v83_v11 = vadd.f32 %v92_v6, %v82_v10 }
  0xcf   :  { %v106_v12 = vpop.f32.mrf.mxu0 }
  0xd0   :  { %87 = vst.msk [vmem:[%s157_s3 + $0x8] sm:$0xff] %vm41_vm1, %v83_v11 }

// kernel: dilated_transformer_decoder_layer.15
= control target key start
LH: loop header
LB: loop body
LE: loop exit
PB: predicated region body
PF: predicated region fallthrough
CT: control target
= control target key end

     0   :  { %vm27_vm0 = vcmask 261120   ;;  %v209_v15 = vmov 0.0   ;;  %vm210_vm1 = vmmov 0   ;;  %vm81_vm2 = vcmask 257024   ;;  %s277_s0 = inlined_call_operand.vmem [shape: f32[16,32], index: 0, kind: input, shape index: {}]   ;;  %s278_s3 = inlined_call_operand.vmem [shape: bf16[32,32], index: 3, kind: input, shape index: {}]   ;;  %s279_s1 = inlined_call_operand.vmem [shape: f32[1,32], index: 1, kind: input, shape index: {}]   ;;  %s280_s2 = inlined_call_operand.vmem [shape: f32[1,32], index: 2, kind: input, shape index: {}]   ;;  %s281_s4 = inlined_call_operand.vmem [shape: f32[1,32], index: 4, kind: input, shape index: {}]   ;;  %s282_s5 = inlined_call_operand.vmem [shape: bf16[16,32], index: 5, kind: output, shape index: {}]  }
   0x1   :  { %v25_v0 = vld [vmem:[%s277_s0] sm:$0xff]  ;;  %v26_v1 = vld [vmem:[%s277_s0 + $0x8] sm:$0xff]  ;;  %192 = vmatprep.subr.bf16.mxu0 %v209_v15  ;;  %196 = vmatprep.mubr.msk.bf16.mxu0 %vm210_vm1, %v209_v15 }
   0x2   :  { %v28_v2 = vsel %vm27_vm0, %v25_v0, 0.0  ;;  %v31_v3 = vsel %vm27_vm0, %v26_v1, 0.0  ;;  %v202_v14 = vld [vmem:[%s278_s3 + $0x8] sm:$0xff]   ;;  %v203_v16 = vld [vmem:[%s278_s3] sm:$0xff]  }
   0x3   :  { %29 = vadd.xlane.f32.xlu0 %v28_v2  ;;  %193 = vmatpush3.bf16.msra.mxu0 %v202_v14  ;;  %v174_v24 = vld [vmem:[%s279_s1] ss:$0 sm:$0xff] }
   0x4   :  { %194 = vmatprep.subr.bf16.mxu0 %v209_v15  ;;  %v175_v26 = vld [vmem:[%s280_s2] ss:$0 sm:$0xff] }
   0x5   :  { %v178_v36 = vld [vmem:[%s281_s4] ss:$0 sm:$0xff] }
   0x7   :  { %32 = vadd.xlane.f32.xlu0 %v31_v3  ;;  %195 = vmatpush3.bf16.msra.mxu0 %v203_v16 }
  0x8c   :  { %v30_v4 = vpop.xlane.xlu0 %29 }
  0x8d   :  { %v35_v5 = vmul.f32 0.03125, %v30_v4 }
  0x8f   :  { %v37_v6 = vsub.f32 %v25_v0, %v35_v5 }
  0x90   :  { %v33_v7 = vpop.xlane.xlu0 %32 }
  0x91   :  { %v36_v8 = vmul.f32 0.03125, %v33_v7  ;;  %v39_v9 = vmul.f32 %v37_v6, %v37_v6 }
  0x93   :  { %v38_v10 = vsub.f32 %v26_v1, %v36_v8  ;;  %v41_v11 = vsel %vm27_vm0, %v39_v9, 0.0 }
  0x94   :  { %42 = vadd.xlane.f32.xlu1 %v41_v11 }
  0x95   :  { %v40_v12 = vmul.f32 %v38_v10, %v38_v10 }
  0x97   :  { %v44_v13 = vsel %vm27_vm0, %v40_v12, 0.0 }
  0x98   :  { %45 = vadd.xlane.f32.xlu1 %v44_v13 }
 0x11d   :  { %v43_v17 = vpop.xlane.xlu1 %42 }
 0x11e   :  { %v47_v18 = vmul.f32 0.03125, %v43_v17 }
 0x120   :  { %v49_v19 = vadd.f32 1e-05, %v47_v18 }
 0x121   :  { %v46_v20 = vpop.xlane.xlu1 %45 }
 0x122   :  { %205 = vrsqrt.f32 %v49_v19  ;;  %v48_v21 = vmul.f32 0.03125, %v46_v20 }
 0x124   :  { %v50_v22 = vadd.f32 1e-05, %v48_v21 }
 0x126   :  { %207 = vrsqrt.f32 %v50_v22 }
 0x12f   :  { %v206_v23 = vpop.eup %205 }
 0x130   :  { %v53_v25 = vmul.f32 %v206_v23, %v37_v6 }
 0x132   :  { %v62_v27 = vmul.f32 %v174_v24, %v53_v25 }
 0x133   :  { %v208_v28 = vpop.eup %207 }
 0x134   :  { %v71_v29 = vadd.f32 %v175_v26, %v62_v27  ;;  %v54_v30 = vmul.f32 %v208_v28, %v38_v10 }
 0x136   :  { %v185_v31 = vpack.c.bf16 %v71_v29, %v71_v29  ;;  %v63_v32 = vmul.f32 %v174_v24, %v54_v30 }
 0x138   :  { %82 = vst.msk [vmem:[#allocation2] sm:$0xf] %vm81_vm2, %v185_v31  ;;  %v72_v33 = vadd.f32 %v175_v26, %v63_v32 }
 0x13a   :  { %v186_v34 = vpack.c.bf16 %v72_v33, %v72_v33 }
 0x13c   :  { %83 = vst.msk [vmem:[#allocation2 + $0x4] sm:$0xf] %vm81_vm2, %v186_v34 }
 0x143   :  { %v204_v35 = vld [vmem:[#allocation2] sm:$0xff]  }
 0x144   :  { %197 = vmatmul.mubr.msk.bf16.vlgmr.msra.gmra.mxu0 %vm27_vm0, %v204_v35 }
 0x204   :  { %v152_v37 = vpop.f32.mrf.mxu0 }
 0x205   :  { %v153_v38 = vadd.f32 %v178_v36, %v152_v37 }
 0x206   :  { %v198_v39 = vpop.f32.mrf.mxu0 }
 0x207   :  { %v187_v40 = vpack.c.bf16 %v153_v38, %v153_v38 }
 0x208   :  { %v155_v41 = vpop.f32.mrf.mxu0 }
 0x209   :  { %168 = vst.msk [vmem:[%s282_s5] sm:$0xf] %vm81_vm2, %v187_v40  ;;  %v156_v42 = vadd.f32 %v178_v36, %v155_v41 }
 0x20a   :  { %v199_v43 = vpop.f32.mrf.mxu0 }
 0x20b   :  { %v188_v44 = vpack.c.bf16 %v156_v42, %v156_v42 }
 0x20d   :  { %169 = vst.msk [vmem:[%s282_s5 + $0x4] sm:$0xf] %vm81_vm2, %v188_v44 }

// kernel: dilated_transformer_decoder_layer.16
= control target key start
LH: loop header
LB: loop body
LE: loop exit
PB: predicated region body
PF: predicated region fallthrough
CT: control target
= control target key end

     0   :  { %v124_v0 = vmov 0.0   ;;  %vm125_vm0 = vmmov 0   ;;  %vm41_vm1 = vcmask 261120   ;;  %vm94_vm2 = vcmask 519168   ;;  %s167_s1 = inlined_call_operand.vmem [shape: bf16[32,64], index: 1, kind: input, shape index: {}]   ;;  %s168_s0 = inlined_call_operand.vmem [shape: f32[16,32], index: 0, kind: input, shape index: {}]   ;;  %s169_s2 = inlined_call_operand.vmem [shape: f32[1,64], index: 2, kind: input, shape index: {}]   ;;  %s170_s3 = inlined_call_operand.vmem [shape: bf16[16,64], index: 3, kind: output, shape index: {}]  }
   0x1   :  { %112 = vmatprep.subr.bf16.mxu0 %v124_v0  ;;  %v122_v1 = vld [vmem:[%s167_s1 + $0x8] sm:$0xff]   ;;  %116 = vmatprep.mubr.msk.bf16.mxu0 %vm125_vm0, %v124_v0  ;;  %v123_v2 = vld [vmem:[%s167_s1] sm:$0xff]  }
   0x2   :  { %113 = vmatpush3.bf16.msra.mxu0 %v122_v1  ;;  %v15_v3 = vld [vmem:[%s168_s0] sm:$0xff]  ;;  %v16_v4 = vld [vmem:[%s168_s0 + $0x8] sm:$0xff] }
   0x3   :  { %114 = vmatprep.subr.bf16.mxu0 %v124_v0  ;;  %v17_v5 = vpack.c.bf16 %v16_v4, %v15_v3  ;;  %v101_v6 = vld [vmem:[%s169_s2] ss:$0 sm:$0xff] }
   0x6   :  { %115 = vmatpush3.bf16.msra.mxu0 %v123_v2 }
   0x9   :  { %117 = vmatmul.mubr.msk.bf16.vlgmr.msra.gmra.mxu0 %vm41_vm1, %v17_v5 }
  0xc9   :  { %v79_v7 = vpop.f32.mrf.mxu0 }
  0xca   :  { %v80_v8 = vadd.f32 %v101_v6, %v79_v7 }
  0xcb   :  { %v118_v9 = vpop.f32.mrf.mxu0 }
  0xcc   :  { %v107_v10 = vpack.c.bf16 %v80_v8, %v80_v8 }
  0xcd   :  { %v82_v11 = vpop.f32.mrf.mxu0 }
  0xce   :  { %95 = vst.msk [vmem:[%s170_s3] sm:$0xf] %vm94_vm2, %v107_v10  ;;  %v83_v12 = vadd.f32 %v101_v6, %v82_v11 }
  0xcf   :  { %v119_v13 = vpop.f32.mrf.mxu0 }
  0xd0   :  { %v108_v14 = vpack.c.bf16 %v83_v12, %v83_v12 }
  0xd2   :  { %96 = vst.msk [vmem:[%s170_s3 + $0x4] sm:$0xf] %vm94_vm2, %v108_v14 }

// kernel: dilated_transformer_decoder_layer.19
= control target key start
LH: loop header
LB: loop body
LE: loop exit
PB: predicated region body
PF: predicated region fallthrough
CT: control target
= control target key end

     0   :  { %vm27_vm0 = vcmask 261120   ;;  %v196_v15 = vmov 0.0   ;;  %vm197_vm1 = vmmov 0   ;;  %vm81_vm2 = vcmask 257024   ;;  %s262_s0 = inlined_call_operand.vmem [shape: f32[16,32], index: 0, kind: input, shape index: {}]   ;;  %s263_s3 = inlined_call_operand.vmem [shape: bf16[32,32], index: 3, kind: input, shape index: {}]   ;;  %s264_s1 = inlined_call_operand.vmem [shape: f32[1,32], index: 1, kind: input, shape index: {}]   ;;  %s265_s2 = inlined_call_operand.vmem [shape: f32[1,32], index: 2, kind: input, shape index: {}]   ;;  %s266_s4 = inlined_call_operand.vmem [shape: f32[1,32], index: 4, kind: input, shape index: {}]   ;;  %s267_s5 = inlined_call_operand.vmem [shape: f32[16,32], index: 5, kind: output, shape index: {}]  }
   0x1   :  { %v25_v0 = vld [vmem:[%s262_s0] sm:$0xff]  ;;  %v26_v1 = vld [vmem:[%s262_s0 + $0x8] sm:$0xff]  ;;  %179 = vmatprep.subr.bf16.mxu0 %v196_v15  ;;  %183 = vmatprep.mubr.msk.bf16.mxu0 %vm197_vm1, %v196_v15 }
   0x2   :  { %v28_v2 = vsel %vm27_vm0, %v25_v0, 0.0  ;;  %v31_v3 = vsel %vm27_vm0, %v26_v1, 0.0  ;;  %v189_v14 = vld [vmem:[%s263_s3 + $0x8] sm:$0xff]   ;;  %v190_v16 = vld [vmem:[%s263_s3] sm:$0xff]  }
   0x3   :  { %29 = vadd.xlane.f32.xlu0 %v28_v2  ;;  %180 = vmatpush3.bf16.msra.mxu0 %v189_v14  ;;  %v165_v24 = vld [vmem:[%s264_s1] ss:$0 sm:$0xff] }
   0x4   :  { %181 = vmatprep.subr.bf16.mxu0 %v196_v15  ;;  %v166_v26 = vld [vmem:[%s265_s2] ss:$0 sm:$0xff] }
   0x5   :  { %v169_v36 = vld [vmem:[%s266_s4] ss:$0 sm:$0xff] }
   0x7   :  { %32 = vadd.xlane.f32.xlu0 %v31_v3  ;;  %182 = vmatpush3.bf16.msra.mxu0 %v190_v16 }
  0x8c   :  { %v30_v4 = vpop.xlane.xlu0 %29 }
  0x8d   :  { %v35_v5 = vmul.f32 0.03125, %v30_v4 }
  0x8f   :  { %v37_v6 = vsub.f32 %v25_v0, %v35_v5 }
  0x90   :  { %v33_v7 = vpop.xlane.xlu0 %32 }
  0x91   :  { %v36_v8 = vmul.f32 0.03125, %v33_v7  ;;  %v39_v9 = vmul.f32 %v37_v6, %v37_v6 }
  0x93   :  { %v38_v10 = vsub.f32 %v26_v1, %v36_v8  ;;  %v41_v11 = vsel %vm27_vm0, %v39_v9, 0.0 }
  0x94   :  { %42 = vadd.xlane.f32.xlu1 %v41_v11 }
  0x95   :  { %v40_v12 = vmul.f32 %v38_v10, %v38_v10 }
  0x97   :  { %v44_v13 = vsel %vm27_vm0, %v40_v12, 0.0 }
  0x98   :  { %45 = vadd.xlane.f32.xlu1 %v44_v13 }
 0x11d   :  { %v43_v17 = vpop.xlane.xlu1 %42 }
 0x11e   :  { %v47_v18 = vmul.f32 0.03125, %v43_v17 }
 0x120   :  { %v49_v19 = vadd.f32 1e-05, %v47_v18 }
 0x121   :  { %v46_v20 = vpop.xlane.xlu1 %45 }
 0x122   :  { %192 = vrsqrt.f32 %v49_v19  ;;  %v48_v21 = vmul.f32 0.03125, %v46_v20 }
 0x124   :  { %v50_v22 = vadd.f32 1e-05, %v48_v21 }
 0x126   :  { %194 = vrsqrt.f32 %v50_v22 }
 0x12f   :  { %v193_v23 = vpop.eup %192 }
 0x130   :  { %v53_v25 = vmul.f32 %v193_v23, %v37_v6 }
 0x132   :  { %v62_v27 = vmul.f32 %v165_v24, %v53_v25 }
 0x133   :  { %v195_v28 = vpop.eup %194 }
 0x134   :  { %v71_v29 = vadd.f32 %v166_v26, %v62_v27  ;;  %v54_v30 = vmul.f32 %v195_v28, %v38_v10 }
 0x136   :  { %v174_v31 = vpack.c.bf16 %v71_v29, %v71_v29  ;;  %v63_v32 = vmul.f32 %v165_v24, %v54_v30 }
 0x138   :  { %82 = vst.msk [vmem:[#allocation2] sm:$0xf] %vm81_vm2, %v174_v31  ;;  %v72_v33 = vadd.f32 %v166_v26, %v63_v32 }
 0x13a   :  { %v175_v34 = vpack.c.bf16 %v72_v33, %v72_v33 }
 0x13c   :  { %83 = vst.msk [vmem:[#allocation2 + $0x4] sm:$0xf] %vm81_vm2, %v175_v34 }
 0x143   :  { %v191_v35 = vld [vmem:[#allocation2] sm:$0xff]  }
 0x144   :  { %184 = vmatmul.mubr.msk.bf16.vlgmr.msra.gmra.mxu0 %vm27_vm0, %v191_v35 }
 0x204   :  { %v152_v37 = vpop.f32.mrf.mxu0 }
 0x205   :  { %v153_v38 = vadd.f32 %v169_v36, %v152_v37 }
 0x206   :  { %v185_v39 = vpop.f32.mrf.mxu0 }
 0x207   :  { %159 = vst.msk [vmem:[%s267_s5] sm:$0xff] %vm27_vm0, %v153_v38 }
 0x208   :  { %v155_v40 = vpop.f32.mrf.mxu0 }
 0x209   :  { %v156_v41 = vadd.f32 %v169_v36, %v155_v40 }
 0x20a   :  { %v186_v42 = vpop.f32.mrf.mxu0 }
 0x20b   :  { %160 = vst.msk [vmem:[%s267_s5 + $0x8] sm:$0xff] %vm27_vm0, %v156_v41 }

// kernel: dilated_transformer_decoder_layer.21
= control target key start
LH: loop header
LB: loop body
LE: loop exit
PB: predicated region body
PF: predicated region fallthrough
CT: control target
= control target key end

     0   :  { %vm29_vm0 = vcmask 523264   ;;  %v229_v16 = vmov 0.0   ;;  %vm230_vm1 = vmmov 0   ;;  %vm83_vm2 = vcmask 519168   ;;  %s296_s0 = inlined_call_operand.vmem [shape: bf16[16,64], index: 0, kind: input, shape index: {}]   ;;  %s297_s3 = inlined_call_operand.vmem [shape: bf16[64,32], index: 3, kind: input, shape index: {}]   ;;  %s298_s1 = inlined_call_operand.vmem [shape: f32[1,64], index: 1, kind: input, shape index: {}]   ;;  %s299_s2 = inlined_call_operand.vmem [shape: f32[1,64], index: 2, kind: input, shape index: {}]   ;;  %s300_s4 = inlined_call_operand.vmem [shape: f32[1,32], index: 4, kind: input, shape index: {}]   ;;  %s301_s5 = inlined_call_operand.vmem [shape: f32[16,32], index: 5, kind: output, shape index: {}]  }
   0x1   :  { %v198_v0 = vld [vmem:[%s296_s0] sm:$0xff]   ;;  %v220_v15 = vld [vmem:[%s297_s3 + $0x18] sm:$0xff]   ;;  %206 = vmatprep.subr.bf16.mxu0 %v229_v16  ;;  %v221_v17 = vld [vmem:[%s297_s3 + $0x10] sm:$0xff]   ;;  %214 = vmatprep.mubr.msk.bf16.mxu0 %vm230_vm1, %v229_v16  ;;  %vm177_vm3 = vcmask 261120  }
   0x2   :  { %v199_v1 = vunpack.c.l.bf16 %v198_v0  ;;  %v200_v2 = vunpack.c.h.bf16 %v198_v0  ;;  %207 = vmatpush3.bf16.msra.mxu0 %v220_v15  ;;  %v222_v18 = vld [vmem:[%s297_s3 + $0x8] sm:$0xff]   ;;  %v223_v19 = vld [vmem:[%s297_s3] sm:$0xff]  }
   0x3   :  { %208 = vmatprep.subr.bf16.mxu0 %v229_v16  ;;  %v184_v27 = vld [vmem:[%s298_s1] ss:$0 sm:$0xff] }
   0x4   :  { %v30_v3 = vsel %vm29_vm0, %v199_v1, 0.0  ;;  %v33_v4 = vsel %vm29_vm0, %v200_v2, 0.0  ;;  %v185_v29 = vld [vmem:[%s299_s2] ss:$0 sm:$0xff] }
   0x5   :  { %31 = vadd.xlane.f32.xlu0 %v30_v3  ;;  %v188_v39 = vld [vmem:[%s300_s4] ss:$0 sm:$0xff] }
   0x6   :  { %209 = vmatpush3.bf16.msra.mxu0 %v221_v17 }
   0x7   :  { %210 = vmatprep.subr.bf16.mxu0 %v229_v16 }
   0x9   :  { %34 = vadd.xlane.f32.xlu0 %v33_v4 }
   0xa   :  { %211 = vmatpush3.bf16.msra.mxu0 %v222_v18 }
   0xb   :  { %212 = vmatprep.subr.bf16.mxu0 %v229_v16 }
   0xe   :  { %213 = vmatpush3.bf16.msra.mxu0 %v223_v19 }
  0x8e   :  { %v32_v5 = vpop.xlane.xlu0 %31 }
  0x8f   :  { %v37_v6 = vmul.f32 0.015625, %v32_v5 }
  0x91   :  { %v39_v7 = vsub.f32 %v199_v1, %v37_v6 }
  0x92   :  { %v35_v8 = vpop.xlane.xlu0 %34 }
  0x93   :  { %v38_v9 = vmul.f32 0.015625, %v35_v8  ;;  %v41_v10 = vmul.f32 %v39_v7, %v39_v7 }
  0x95   :  { %v40_v11 = vsub.f32 %v200_v2, %v38_v9  ;;  %v43_v12 = vsel %vm29_vm0, %v41_v10, 0.0 }
  0x96   :  { %44 = vadd.xlane.f32.xlu1 %v43_v12 }
  0x97   :  { %v42_v13 = vmul.f32 %v40_v11, %v40_v11 }
  0x99   :  { %v46_v14 = vsel %vm29_vm0, %v42_v13, 0.0 }
  0x9a   :  { %47 = vadd.xlane.f32.xlu1 %v46_v14 }
 0x11f   :  { %v45_v20 = vpop.xlane.xlu1 %44 }
 0x120   :  { %v49_v21 = vmul.f32 0.015625, %v45_v20 }
 0x122   :  { %v51_v22 = vadd.f32 1e-05, %v49_v21 }
 0x123   :  { %v48_v23 = vpop.xlane.xlu1 %47 }
 0x124   :  { %225 = vrsqrt.f32 %v51_v22  ;;  %v50_v24 = vmul.f32 0.015625, %v48_v23 }
 0x126   :  { %v52_v25 = vadd.f32 1e-05, %v50_v24 }
 0x128   :  { %227 = vrsqrt.f32 %v52_v25 }
 0x131   :  { %v226_v26 = vpop.eup %225 }
 0x132   :  { %v55_v28 = vmul.f32 %v226_v26, %v39_v7 }
 0x134   :  { %v64_v30 = vmul.f32 %v184_v27, %v55_v28 }
 0x135   :  { %v228_v31 = vpop.eup %227 }
 0x136   :  { %v73_v32 = vadd.f32 %v185_v29, %v64_v30  ;;  %v56_v33 = vmul.f32 %v228_v31, %v40_v11 }
 0x138   :  { %v195_v34 = vpack.c.bf16 %v73_v32, %v73_v32  ;;  %v65_v35 = vmul.f32 %v184_v27, %v56_v33 }
 0x13a   :  { %84 = vst.msk [vmem:[#allocation2] sm:$0xf] %vm83_vm2, %v195_v34  ;;  %v74_v36 = vadd.f32 %v185_v29, %v65_v35 }
 0x13c   :  { %v196_v37 = vpack.c.bf16 %v74_v36, %v74_v36 }
 0x13e   :  { %85 = vst.msk [vmem:[#allocation2 + $0x4] sm:$0xf] %vm83_vm2, %v196_v37 }
 0x145   :  { %v224_v38 = vld [vmem:[#allocation2] sm:$0xff]  }
 0x146   :  { %215 = vmatmul.mubr.msk.bf16.vlgmr.msra.gmra.mxu0 %vm29_vm0, %v224_v38 }
 0x206   :  { %v170_v40 = vpop.f32.mrf.mxu0 }
 0x207   :  { %v171_v41 = vadd.f32 %v188_v39, %v170_v40 }
 0x208   :  { %v216_v42 = vpop.f32.mrf.mxu0 }
 0x209   :  { %178 = vst.msk [vmem:[%s301_s5] sm:$0xff] %vm177_vm3, %v171_v41 }
 0x20a   :  { %v173_v43 = vpop.f32.mrf.mxu0 }
 0x20b   :  { %v174_v44 = vadd.f32 %v188_v39, %v173_v43 }
 0x20c   :  { %v217_v45 = vpop.f32.mrf.mxu0 }
 0x20d   :  { %179 = vst.msk [vmem:[%s301_s5 + $0x8] sm:$0xff] %vm177_vm3, %v174_v44 }

// kernel: dilated_transformer_decoder_layer.20
= control target key start
LH: loop header
LB: loop body
LE: loop exit
PB: predicated region body
PF: predicated region fallthrough
CT: control target
= control target key end

     0   :  { %vm27_vm0 = vcmask 261120   ;;  %v211_v15 = vmov 0.0   ;;  %vm212_vm1 = vmmov 0   ;;  %vm81_vm2 = vcmask 257024   ;;  %s275_s0 = inlined_call_operand.vmem [shape: f32[16,32], index: 0, kind: input, shape index: {}]   ;;  %s276_s3 = inlined_call_operand.vmem [shape: bf16[32,64], index: 3, kind: input, shape index: {}]   ;;  %s277_s1 = inlined_call_operand.vmem [shape: f32[1,32], index: 1, kind: input, shape index: {}]   ;;  %s278_s2 = inlined_call_operand.vmem [shape: f32[1,32], index: 2, kind: input, shape index: {}]   ;;  %s279_s4 = inlined_call_operand.vmem [shape: f32[1,64], index: 4, kind: input, shape index: {}]   ;;  %s280_s5 = inlined_call_operand.vmem [shape: bf16[16,64], index: 5, kind: output, shape index: {}]  }
   0x1   :  { %v25_v0 = vld [vmem:[%s275_s0] sm:$0xff]  ;;  %v26_v1 = vld [vmem:[%s275_s0 + $0x8] sm:$0xff]  ;;  %194 = vmatprep.subr.bf16.mxu0 %v211_v15  ;;  %198 = vmatprep.mubr.msk.bf16.mxu0 %vm212_vm1, %v211_v15  ;;  %vm169_vm3 = vcmask 519168  }
   0x2   :  { %v28_v2 = vsel %vm27_vm0, %v25_v0, 0.0  ;;  %v31_v3 = vsel %vm27_vm0, %v26_v1, 0.0  ;;  %v204_v14 = vld [vmem:[%s276_s3 + $0x8] sm:$0xff]   ;;  %v205_v16 = vld [vmem:[%s276_s3] sm:$0xff]  }
   0x3   :  { %29 = vadd.xlane.f32.xlu0 %v28_v2  ;;  %195 = vmatpush3.bf16.msra.mxu0 %v204_v14  ;;  %v176_v24 = vld [vmem:[%s277_s1] ss:$0 sm:$0xff] }
   0x4   :  { %196 = vmatprep.subr.bf16.mxu0 %v211_v15  ;;  %v177_v26 = vld [vmem:[%s278_s2] ss:$0 sm:$0xff] }
   0x5   :  { %v180_v36 = vld [vmem:[%s279_s4] ss:$0 sm:$0xff] }
   0x7   :  { %32 = vadd.xlane.f32.xlu0 %v31_v3  ;;  %197 = vmatpush3.bf16.msra.mxu0 %v205_v16 }
  0x8c   :  { %v30_v4 = vpop.xlane.xlu0 %29 }
  0x8d   :  { %v35_v5 = vmul.f32 0.03125, %v30_v4 }
  0x8f   :  { %v37_v6 = vsub.f32 %v25_v0, %v35_v5 }
  0x90   :  { %v33_v7 = vpop.xlane.xlu0 %32 }
  0x91   :  { %v36_v8 = vmul.f32 0.03125, %v33_v7  ;;  %v39_v9 = vmul.f32 %v37_v6, %v37_v6 }
  0x93   :  { %v38_v10 = vsub.f32 %v26_v1, %v36_v8  ;;  %v41_v11 = vsel %vm27_vm0, %v39_v9, 0.0 }
  0x94   :  { %42 = vadd.xlane.f32.xlu1 %v41_v11 }
  0x95   :  { %v40_v12 = vmul.f32 %v38_v10, %v38_v10 }
  0x97   :  { %v44_v13 = vsel %vm27_vm0, %v40_v12, 0.0 }
  0x98   :  { %45 = vadd.xlane.f32.xlu1 %v44_v13 }
 0x11d   :  { %v43_v17 = vpop.xlane.xlu1 %42 }
 0x11e   :  { %v47_v18 = vmul.f32 0.03125, %v43_v17 }
 0x120   :  { %v49_v19 = vadd.f32 1e-05, %v47_v18 }
 0x121   :  { %v46_v20 = vpop.xlane.xlu1 %45 }
 0x122   :  { %207 = vrsqrt.f32 %v49_v19  ;;  %v48_v21 = vmul.f32 0.03125, %v46_v20 }
 0x124   :  { %v50_v22 = vadd.f32 1e-05, %v48_v21 }
 0x126   :  { %209 = vrsqrt.f32 %v50_v22 }
 0x12f   :  { %v208_v23 = vpop.eup %207 }
 0x130   :  { %v53_v25 = vmul.f32 %v208_v23, %v37_v6 }
 0x132   :  { %v62_v27 = vmul.f32 %v176_v24, %v53_v25 }
 0x133   :  { %v210_v28 = vpop.eup %209 }
 0x134   :  { %v71_v29 = vadd.f32 %v177_v26, %v62_v27  ;;  %v54_v30 = vmul.f32 %v210_v28, %v38_v10 }
 0x136   :  { %v187_v31 = vpack.c.bf16 %v71_v29, %v71_v29  ;;  %v63_v32 = vmul.f32 %v176_v24, %v54_v30 }
 0x138   :  { %82 = vst.msk [vmem:[#allocation2] sm:$0xf] %vm81_vm2, %v187_v31  ;;  %v72_v33 = vadd.f32 %v177_v26, %v63_v32 }
 0x13a   :  { %v188_v34 = vpack.c.bf16 %v72_v33, %v72_v33 }
 0x13c   :  { %83 = vst.msk [vmem:[#allocation2 + $0x4] sm:$0xf] %vm81_vm2, %v188_v34 }
 0x143   :  { %v206_v35 = vld [vmem:[#allocation2] sm:$0xff]  }
 0x144   :  { %199 = vmatmul.mubr.msk.bf16.vlgmr.msra.gmra.mxu0 %vm27_vm0, %v206_v35 }
 0x204   :  { %v152_v37 = vpop.f32.mrf.mxu0 }
 0x205   :  { %v153_v38 = vadd.f32 %v180_v36, %v152_v37 }
 0x206   :  { %v200_v39 = vpop.f32.mrf.mxu0 }
 0x207   :  { %v159_v40 = vmax.f32 %v153_v38, 0.0 }
 0x208   :  { %v155_v41 = vpop.f32.mrf.mxu0 }
 0x209   :  { %v189_v42 = vpack.c.bf16 %v159_v40, %v159_v40  ;;  %v156_v43 = vadd.f32 %v180_v36, %v155_v41 }
 0x20a   :  { %v201_v44 = vpop.f32.mrf.mxu0 }
 0x20b   :  { %170 = vst.msk [vmem:[%s280_s5] sm:$0xf] %vm169_vm3, %v189_v42  ;;  %v160_v45 = vmax.f32 %v156_v43, 0.0 }
 0x20d   :  { %v190_v46 = vpack.c.bf16 %v160_v45, %v160_v45 }
 0x20f   :  { %171 = vst.msk [vmem:[%s280_s5 + $0x4] sm:$0xf] %vm169_vm3, %v190_v46 }

</bundles_post_ra>
